<compile_context>
chip_gen: v6e
topology: v6e:2x2x1
jax: 0.10.0
libtpu: 0.0.40
codegen_flags: <defaults>
</compile_context>

<pallas_src>
import jax
import jax.numpy as jnp
from jax import lax
from jax.experimental import pallas as pl
from jax.experimental.pallas import tpu as pltpu


# -----------------------------------------------------------------------------
# Shared wrapper-side im2col with phase-major lane layout.
# lane index = (2x2 pool phase)*N*Ho*Wo + n*Ho*Wo + (io*Wo + jo)
# TODO(synk): im2col stays in the JAX wrapper (pure data rearrangement); an
# in-kernel roll/mask im2col would cut HBM traffic ~9x at real image sizes.
# -----------------------------------------------------------------------------
def _im2col_phase_major(x_nhwc, w_oihw, pool=2):
    N, H, W, Cin = x_nhwc.shape
    Cout = w_oihw.shape[0]
    Ho, Wo = H // pool, W // pool
    L = N * Ho * Wo
    xp = jnp.pad(x_nhwc, ((0, 0), (1, 1), (1, 1), (0, 0)))
    cols = jnp.concatenate(
        [xp[:, di:di + H, dj:dj + W, :] for di in range(3) for dj in range(3)],
        axis=-1)                                          # (N, H, W, 9*Cin), (di,dj,ci)-minor
    cols6 = cols.reshape(N, Ho, pool, Wo, pool, 9 * Cin)  # n, io, pi, jo, pj, c
    colsT = jnp.transpose(cols6, (5, 2, 4, 0, 1, 3)).reshape(9 * Cin, pool * pool * L)
    # weight (Cout,Cin,3,3) -> (Cout, 9*Cin) matching the (di, dj, ci) column order
    w_mat = jnp.transpose(w_oihw, (0, 2, 3, 1)).reshape(Cout, 9 * Cin)
    return colsT, w_mat, (N, Ho, Wo, Cout, L)


# -----------------------------------------------------------------------------
# Kernel 1: conv1 (im2col matmul, bf16/f32) + bias + ReLU + 2x2 average pool.
# -----------------------------------------------------------------------------
def conv_relu_pool_kernel(xc_ref, w_ref, b_ref, o_ref):
    L = o_ref.shape[1]                                    # N * Ho * Wo
    y = jnp.dot(w_ref[...], xc_ref[...], preferred_element_type=jnp.float32)
    y = jnp.maximum(y + b_ref[...], 0.0)                  # bias + ReLU (f32)
    # AvgPool2d(2,2): mean of the 4 phase blocks (static lane slices).
    o_ref[...] = 0.25 * (y[:, 0:L] + y[:, L:2 * L] + y[:, 2 * L:3 * L] + y[:, 3 * L:4 * L])


def conv_relu_pool(x_nhwc, w_oihw, b, *, pool=2):
    colsT, w_mat, (N, Ho, Wo, Cout, L) = _im2col_phase_major(x_nhwc, w_oihw, pool)
    out = pl.pallas_call(
        conv_relu_pool_kernel,
        out_shape=jax.ShapeDtypeStruct((Cout, L), jnp.float32),
    )(colsT.astype(jnp.bfloat16), w_mat.astype(jnp.bfloat16), b.reshape(Cout, 1))
    # (Cout, N*Ho*Wo) -> (N, Ho, Wo, Cout)
    return jnp.transpose(out.reshape(Cout, N, Ho, Wo), (1, 2, 3, 0))


# -----------------------------------------------------------------------------
# Kernel 2: conv2+pool2 + NetVLAD (soft assign / softmax over K / residual
#           aggregation / intra+global L2 norm) + FC + sigmoid RNN + MSE.
# -----------------------------------------------------------------------------
def conv_netvlad_fc_rnn_mse_kernel(cols_ref, w2_ref, b2_ref, cent_ref, wc_ref, bc_ref,
                                   fcw_ref, fcb_ref, cap_ref, wx_ref, wh_ref, bh_ref,
                                   wo_ref, bo_ref, loss_ref, flat_scr):
    K, D = cent_ref.shape
    N = flat_scr.shape[0]
    NP = cols_ref.shape[1] // 4                           # N * P (pooled positions)
    P = NP // N
    T, Dc = cap_ref.shape

    # ---- conv2 (im2col matmul, bf16 ops / f32 acc) + bias + ReLU + 2x2 avg pool ----
    y = jnp.dot(w2_ref[...], cols_ref[...], preferred_element_type=jnp.float32)   # (D, 4*NP)
    y = jnp.maximum(y + b2_ref[...], 0.0)
    x = 0.25 * (y[:, 0:NP] + y[:, NP:2 * NP] + y[:, 2 * NP:3 * NP] + y[:, 3 * NP:4 * NP])  # (D, N*P)

    # ---- NetVLAD soft assignment: 1x1 conv == matmul over D, softmax over clusters ----
    logits = jnp.dot(wc_ref[...], x, preferred_element_type=jnp.float32) + bc_ref[...]     # (K, N*P)
    m = jnp.max(logits, axis=0, keepdims=True)
    e = jnp.exp(logits - m)
    a = e * pl.reciprocal(jnp.sum(e, axis=0, keepdims=True), approx=True)                  # (K, N*P)

    # ---- per-sample residual aggregation + intra-cluster L2 norm + k-major flatten ----
    cent = cent_ref[...]                                                                   # (K, D)
    for n in range(N):                                                                     # static, tiny
        a_n = a[:, n * P:(n + 1) * P]                                                      # (K, P)
        x_n = x[:, n * P:(n + 1) * P]                                                      # (D, P)
        s_n = lax.dot_general(a_n, x_n, (((1,), (1,)), ((), ())),
                              preferred_element_type=jnp.float32)                          # (K, D)
        v_n = s_n - cent * jnp.sum(a_n, axis=1, keepdims=True)                             # (K, D)
        # F.normalize(vlad, dim=2), eps=1e-12
        v_n = v_n * lax.rsqrt(jnp.maximum(jnp.sum(v_n * v_n, axis=1, keepdims=True), 1e-24))
        for k in range(K):                                                                 # torch vlad.view(N,-1)
            flat_scr[n:n + 1, k * D:(k + 1) * D] = v_n[k:k + 1, :]

    # ---- FC; global L2 norm is a per-sample scalar and commutes with the linear matmul ----
    flat = flat_scr[...]                                                                   # (N, K*D)
    gsq = jnp.sum(flat * flat, axis=-1, keepdims=True)
    feat = (jnp.dot(flat, fcw_ref[...], preferred_element_type=jnp.float32)
            * lax.rsqrt(jnp.maximum(gsq, 1e-24))) + fcb_ref[...]                           # (N, Hd)

    # ---- teacher-forced sigmoid RNN on sample 0 + MSE against cap[0] ----
    cap = cap_ref[...]                                                                     # (T, Dc)
    wh = wh_ref[...]
    wo = wo_ref[...]
    bo = bo_ref[...]
    # all input projections (+ hidden bias) in one matmul before the recurrence
    xproj = jnp.dot(cap, wx_ref[...], preferred_element_type=jnp.float32) + bh_ref[...]    # (T, Hd)
    h = feat[0:1, :]                                                                       # (1, Hd)
    sse = jnp.zeros((1, 1), jnp.float32)                      # output[0] = cap[0] -> zero error
    for t in range(1, T):                                     # T static
        pre_h = xproj[t - 1:t, :] + jnp.dot(h, wh, preferred_element_type=jnp.float32)
        h = pl.reciprocal(1.0 + jnp.exp(-pre_h), approx=True)                              # sigmoid
        pre_y = jnp.dot(h, wo, preferred_element_type=jnp.float32) + bo
        yt = pl.reciprocal(1.0 + jnp.exp(-pre_y), approx=True)
        d = yt - cap[t:t + 1, :]
        sse = sse + jnp.sum(d * d, keepdims=True)
    # MSELoss averages over all T*Dc elements (t=0 contributes exactly 0).
    loss_ref[...] = sse * (1.0 / float(T * Dc))


def conv_netvlad_fc_rnn_mse(x_nhwc, w2, b2, centroids, beta, fc_w, fc_b, cap0,
                            w_hidden, b_hidden, w_output, b_output):
    K, D = centroids.shape
    Hd = fc_w.shape[0]
    Dc = cap0.shape[1]
    cols2, w2_mat, (N, Ho, Wo, Cout, L) = _im2col_phase_major(x_nhwc, w2)

    # NetVLAD 1x1-conv params, channel-first: weight (K, D), bias (K, 1)
    wc = 2.0 * beta * centroids
    bc = (-beta * jnp.sqrt(jnp.sum(centroids * centroids, axis=1))).reshape(K, 1)
    fcw = fc_w.T                                    # (K*D, Hd): rows k-major == torch view(N,-1)
    fcb = fc_b.reshape(1, Hd)
    wt = w_hidden.T                                 # (Dc+Hd, Hd); cat order = [x, h]
    wx, wh = wt[:Dc], wt[Dc:]
    bh = b_hidden.reshape(1, Hd)
    wo = w_output.T                                 # (Hd, Dout)
    bo = b_output.reshape(1, -1)

    loss = pl.pallas_call(
        conv_netvlad_fc_rnn_mse_kernel,
        out_shape=jax.ShapeDtypeStruct((1, 1), jnp.float32),
        scratch_shapes=[pltpu.VMEM((N, K * D), jnp.float32)],
    )(cols2.astype(jnp.bfloat16), w2_mat.astype(jnp.bfloat16), b2.reshape(Cout, 1),
      centroids, wc, bc, fcw, fcb, cap0, wx, wh, bh, wo, bo)
    return loss[0, 0]


# -----------------------------------------------------------------------------
# Full ImgCap.forward
# -----------------------------------------------------------------------------
def imgcap_forward(img, cap, p):
    x = jnp.transpose(img, (0, 2, 3, 1))                 # NCHW -> NHWC
    x = conv_relu_pool(x, p["w1"], p["b1"])              # (N, H/2, W/2, 4)
    return conv_netvlad_fc_rnn_mse(x, p["w2"], p["b2"], p["centroids"], p["beta"],
                                   p["fc_w"], p["fc_b"], cap[0],
                                   p["w_hidden"], p["b_hidden"],
                                   p["w_output"], p["b_output"])


if __name__ == "__main__":
    key = jax.random.PRNGKey(0)
    ks = jax.random.split(key, 13)

    # hyperparameters (ImgCap(clusters, alpha, rnn_inp, rnn_hid, rnn_out, vocab, emb))
    clusters, alpha = 8, 1.0
    rnn_inp = rnn_out = 16     # caption embedding dim (must equal rnn_out for the MSE)
    rnn_hid = 32
    N, H, W, T = 2, 16, 16, 8

    img = jax.random.normal(ks[0], (N, 3, H, W), jnp.float32)          # NCHW like PyTorch
    cap = jax.random.uniform(ks[1], (N, T, rnn_inp), jnp.float32)

    params = dict(
        w1=jax.random.normal(ks[2], (4, 3, 3, 3), jnp.float32) * 0.1,
        b1=jax.random.normal(ks[3], (4,), jnp.float32) * 0.1,
        w2=jax.random.normal(ks[4], (16, 4, 3, 3), jnp.float32) * 0.1,
        b2=jax.random.normal(ks[5], (16,), jnp.float32) * 0.1,
        centroids=jax.random.uniform(ks[6], (clusters, 16), jnp.float32),  # torch.rand(K, D)
        beta=alpha,
        fc_w=jax.random.normal(ks[7], (rnn_hid, 16 * clusters), jnp.float32) * 0.1,
        fc_b=jax.random.normal(ks[8], (rnn_hid,), jnp.float32) * 0.1,
        w_hidden=jax.random.normal(ks[9], (rnn_hid, rnn_inp + rnn_hid), jnp.float32) * 0.1,
        b_hidden=jax.random.normal(ks[10], (rnn_hid,), jnp.float32) * 0.1,
        w_output=jax.random.normal(ks[11], (rnn_out, rnn_hid), jnp.float32) * 0.1,
        b_output=jax.random.normal(ks[12], (rnn_out,), jnp.float32) * 0.1,
    )
    # TODO(synk): vocab / emb are only used by generate()/similarTo(), not forward(); omitted.

    loss = jax.jit(imgcap_forward)(img, cap, params)
    jax.block_until_ready(loss)
    print("KERNEL_OK")
</pallas_src>

<mosaic_0001>
module attributes {stable_mosaic.version = 11 : i64} {
  func.func @conv_relu_pool_kernel(%arg0: memref<27x512xbf16, #tpu.memory_space<vmem>>, %arg1: memref<4x27xbf16, #tpu.memory_space<vmem>>, %arg2: memref<4x1xf32, #tpu.memory_space<vmem>>, %arg3: memref<4x128xf32, #tpu.memory_space<vmem>>) attributes {dimension_semantics = [], scalar_prefetch = 0 : i64, scratch_operands = 0 : i64, tpu.core_type = #tpu.core_type<tc>} {
    %c0 = arith.constant 0 : index
    %c0_0 = arith.constant 0 : index
    %0 = vector.load %arg1[%c0, %c0_0] : memref<4x27xbf16, #tpu.memory_space<vmem>>, vector<4x27xbf16>
    %c0_1 = arith.constant 0 : index
    %c0_2 = arith.constant 0 : index
    %1 = vector.load %arg0[%c0_1, %c0_2] : memref<27x512xbf16, #tpu.memory_space<vmem>>, vector<27x512xbf16>
    %cst = arith.constant dense<0.000000e+00> : vector<4x512xf32>
    %2 = tpu.matmul %0, %1, %cst {dimension_numbers = #tpu.dot_dimension_numbers<[1], [0], [0], [1], [0, 0, 1, 1], [], []>} : vector<4x27xbf16>, vector<27x512xbf16>, vector<4x512xf32> -> vector<4x512xf32>
    %c0_3 = arith.constant 0 : index
    %c0_4 = arith.constant 0 : index
    %3 = vector.load %arg2[%c0_3, %c0_4] : memref<4x1xf32, #tpu.memory_space<vmem>>, vector<4x1xf32>
    %4 = vector.broadcast %3 : vector<4x1xf32> to vector<4x512xf32>
    %5 = arith.addf %2, %4 : vector<4x512xf32>
    %cst_5 = arith.constant 0.000000e+00 : f32
    %6 = vector.broadcast %cst_5 : f32 to vector<4x512xf32>
    %7 = arith.maximumf %5, %6 : vector<4x512xf32>
    %8 = vector.extract_strided_slice %7 {offsets = [0, 0], sizes = [4, 128], strides = [1, 1]} : vector<4x512xf32> to vector<4x128xf32>
    %9 = vector.extract_strided_slice %7 {offsets = [0, 128], sizes = [4, 128], strides = [1, 1]} : vector<4x512xf32> to vector<4x128xf32>
    %10 = arith.addf %8, %9 : vector<4x128xf32>
    %11 = vector.extract_strided_slice %7 {offsets = [0, 256], sizes = [4, 128], strides = [1, 1]} : vector<4x512xf32> to vector<4x128xf32>
    %12 = arith.addf %10, %11 : vector<4x128xf32>
    %13 = vector.extract_strided_slice %7 {offsets = [0, 384], sizes = [4, 128], strides = [1, 1]} : vector<4x512xf32> to vector<4x128xf32>
    %14 = arith.addf %12, %13 : vector<4x128xf32>
    %cst_6 = arith.constant 2.500000e-01 : f32
    %15 = vector.broadcast %cst_6 : f32 to vector<4x128xf32>
    %16 = arith.mulf %15, %14 : vector<4x128xf32>
    %c0_7 = arith.constant 0 : index
    %c0_8 = arith.constant 0 : index
    %17 = vector.load %arg3[%c0_7, %c0_8] : memref<4x128xf32, #tpu.memory_space<vmem>>, vector<4x128xf32>
    tpu.vector_store %arg3[%c0_7, %c0_8], %16 {strides = array<i32>} : memref<4x128xf32, #tpu.memory_space<vmem>>, vector<4x128xf32>,
    return
  }
}

module attributes {stable_mosaic.version = 11 : i64} {
  func.func @conv_netvlad_fc_rnn_mse_kernel(%arg0: memref<36x128xbf16, #tpu.memory_space<vmem>>, %arg1: memref<16x36xbf16, #tpu.memory_space<vmem>>, %arg2: memref<16x1xf32, #tpu.memory_space<vmem>>, %arg3: memref<8x16xf32, #tpu.memory_space<vmem>>, %arg4: memref<8x16xf32, #tpu.memory_space<vmem>>, %arg5: memref<8x1xf32, #tpu.memory_space<vmem>>, %arg6: memref<128x32xf32, #tpu.memory_space<vmem>>, %arg7: memref<1x32xf32, #tpu.memory_space<vmem>>, %arg8: memref<8x16xf32, #tpu.memory_space<vmem>>, %arg9: memref<16x32xf32, #tpu.memory_space<vmem>>, %arg10: memref<32x32xf32, #tpu.memory_space<vmem>>, %arg11: memref<1x32xf32, #tpu.memory_space<vmem>>, %arg12: memref<32x16xf32, #tpu.memory_space<vmem>>, %arg13: memref<1x16xf32, #tpu.memory_space<vmem>>, %arg14: memref<1x1xf32, #tpu.memory_space<vmem>>, %arg15: memref<2x128xf32, #tpu.memory_space<vmem>>) attributes {dimension_semantics = [], scalar_prefetch = 0 : i64, scratch_operands = 1 : i64, tpu.core_type = #tpu.core_type<tc>} {
    %c0 = arith.constant 0 : index
    %c0_0 = arith.constant 0 : index
    %0 = vector.load %arg1[%c0, %c0_0] : memref<16x36xbf16, #tpu.memory_space<vmem>>, vector<16x36xbf16>
    %c0_1 = arith.constant 0 : index
    %c0_2 = arith.constant 0 : index
    %1 = vector.load %arg0[%c0_1, %c0_2] : memref<36x128xbf16, #tpu.memory_space<vmem>>, vector<36x128xbf16>
    %cst = arith.constant dense<0.000000e+00> : vector<16x128xf32>
    %2 = tpu.matmul %0, %1, %cst {dimension_numbers = #tpu.dot_dimension_numbers<[1], [0], [0], [1], [0, 0, 1, 1], [], []>} : vector<16x36xbf16>, vector<36x128xbf16>, vector<16x128xf32> -> vector<16x128xf32>
    %c0_3 = arith.constant 0 : index
    %c0_4 = arith.constant 0 : index
    %3 = vector.load %arg2[%c0_3, %c0_4] : memref<16x1xf32, #tpu.memory_space<vmem>>, vector<16x1xf32>
    %4 = vector.broadcast %3 : vector<16x1xf32> to vector<16x128xf32>
    %5 = arith.addf %2, %4 : vector<16x128xf32>
    %cst_5 = arith.constant 0.000000e+00 : f32
    %6 = vector.broadcast %cst_5 : f32 to vector<16x128xf32>
    %7 = arith.maximumf %5, %6 : vector<16x128xf32>
    %8 = vector.extract_strided_slice %7 {offsets = [0, 0], sizes = [16, 32], strides = [1, 1]} : vector<16x128xf32> to vector<16x32xf32>
    %9 = vector.extract_strided_slice %7 {offsets = [0, 32], sizes = [16, 32], strides = [1, 1]} : vector<16x128xf32> to vector<16x32xf32>
    %10 = arith.addf %8, %9 : vector<16x32xf32>
    %11 = vector.extract_strided_slice %7 {offsets = [0, 64], sizes = [16, 32], strides = [1, 1]} : vector<16x128xf32> to vector<16x32xf32>
    %12 = arith.addf %10, %11 : vector<16x32xf32>
    %13 = vector.extract_strided_slice %7 {offsets = [0, 96], sizes = [16, 32], strides = [1, 1]} : vector<16x128xf32> to vector<16x32xf32>
    %14 = arith.addf %12, %13 : vector<16x32xf32>
    %cst_6 = arith.constant 2.500000e-01 : f32
    %15 = vector.broadcast %cst_6 : f32 to vector<16x32xf32>
    %16 = arith.mulf %15, %14 : vector<16x32xf32>
    %c0_7 = arith.constant 0 : index
    %c0_8 = arith.constant 0 : index
    %17 = vector.load %arg4[%c0_7, %c0_8] : memref<8x16xf32, #tpu.memory_space<vmem>>, vector<8x16xf32>
    %cst_9 = arith.constant dense<0.000000e+00> : vector<8x32xf32>
    %18 = tpu.matmul %17, %16, %cst_9 {dimension_numbers = #tpu.dot_dimension_numbers<[1], [0], [0], [1], [0, 0, 1, 1], [], []>} : vector<8x16xf32>, vector<16x32xf32>, vector<8x32xf32> -> vector<8x32xf32>
    %c0_10 = arith.constant 0 : index
    %c0_11 = arith.constant 0 : index
    %19 = vector.load %arg5[%c0_10, %c0_11] : memref<8x1xf32, #tpu.memory_space<vmem>>, vector<8x1xf32>
    %20 = vector.broadcast %19 : vector<8x1xf32> to vector<8x32xf32>
    %21 = arith.addf %18, %20 : vector<8x32xf32>
    %cst_12 = arith.constant dense<0xFF800000> : vector<32xf32>
    %22 = vector.multi_reduction <maximumf>, %21, %cst_12 [0] : vector<8x32xf32> to vector<32xf32>
    %23 = vector.shape_cast %22 : vector<32xf32> to vector<1x32xf32>
    %24 = vector.broadcast %23 : vector<1x32xf32> to vector<8x32xf32>
    %25 = arith.subf %21, %24 : vector<8x32xf32>
    %26 = math.exp %25 : vector<8x32xf32>
    %cst_13 = arith.constant dense<0.000000e+00> : vector<32xf32>
    %27 = vector.multi_reduction <add>, %26, %cst_13 [0] : vector<8x32xf32> to vector<32xf32>
    %28 = vector.shape_cast %27 : vector<32xf32> to vector<1x32xf32>
    %29 = tpu.reciprocal %28 {approx = true} : vector<1x32xf32> -> vector<1x32xf32>
    %30 = vector.broadcast %29 : vector<1x32xf32> to vector<8x32xf32>
    %31 = arith.mulf %26, %30 : vector<8x32xf32>
    %c0_14 = arith.constant 0 : index
    %c0_15 = arith.constant 0 : index
    %32 = vector.load %arg3[%c0_14, %c0_15] : memref<8x16xf32, #tpu.memory_space<vmem>>, vector<8x16xf32>
    %33 = vector.extract_strided_slice %31 {offsets = [0, 0], sizes = [8, 16], strides = [1, 1]} : vector<8x32xf32> to vector<8x16xf32>
    %34 = vector.extract_strided_slice %16 {offsets = [0, 0], sizes = [16, 16], strides = [1, 1]} : vector<16x32xf32> to vector<16x16xf32>
    %cst_16 = arith.constant dense<0.000000e+00> : vector<8x16xf32>
    %35 = tpu.matmul %33, %34, %cst_16 {dimension_numbers = #tpu.dot_dimension_numbers<[1], [1], [0], [0], [0, 0, 1, 0], [], []>} : vector<8x16xf32>, vector<16x16xf32>, vector<8x16xf32> -> vector<8x16xf32>
    %cst_17 = arith.constant dense<0.000000e+00> : vector<8xf32>
    %36 = vector.multi_reduction <add>, %33, %cst_17 [1] : vector<8x16xf32> to vector<8xf32>
    %37 = vector.shape_cast %36 : vector<8xf32> to vector<8x1xf32>
    %38 = vector.broadcast %37 : vector<8x1xf32> to vector<8x16xf32>
    %39 = arith.mulf %32, %38 : vector<8x16xf32>
    %40 = arith.subf %35, %39 : vector<8x16xf32>
    %41 = arith.mulf %40, %40 : vector<8x16xf32>
    %cst_18 = arith.constant dense<0.000000e+00> : vector<8xf32>
    %42 = vector.multi_reduction <add>, %41, %cst_18 [1] : vector<8x16xf32> to vector<8xf32>
    %43 = vector.shape_cast %42 : vector<8xf32> to vector<8x1xf32>
    %cst_19 = arith.constant 1.000000e-24 : f32
    %44 = vector.broadcast %cst_19 : f32 to vector<8x1xf32>
    %45 = arith.maximumf %43, %44 : vector<8x1xf32>
    %46 = math.rsqrt %45 : vector<8x1xf32>
    %47 = vector.broadcast %46 : vector<8x1xf32> to vector<8x16xf32>
    %48 = arith.mulf %40, %47 : vector<8x16xf32>
    %49 = vector.extract_strided_slice %48 {offsets = [0, 0], sizes = [1, 16], strides = [1, 1]} : vector<8x16xf32> to vector<1x16xf32>
    %c0_20 = arith.constant 0 : index
    %c0_21 = arith.constant 0 : index
    %50 = vector.load %arg15[%c0_20, %c0_21] : memref<2x128xf32, #tpu.memory_space<vmem>>, vector<1x16xf32>
    tpu.vector_store %arg15[%c0_20, %c0_21], %49 {strides = array<i32>} : memref<2x128xf32, #tpu.memory_space<vmem>>, vector<1x16xf32>,
    %51 = vector.extract_strided_slice %48 {offsets = [1, 0], sizes = [1, 16], strides = [1, 1]} : vector<8x16xf32> to vector<1x16xf32>
    %c0_22 = arith.constant 0 : index
    %c16 = arith.constant 16 : index
    %52 = vector.load %arg15[%c0_22, %c16] : memref<2x128xf32, #tpu.memory_space<vmem>>, vector<1x16xf32>
    tpu.vector_store %arg15[%c0_22, %c16], %51 {strides = array<i32>} : memref<2x128xf32, #tpu.memory_space<vmem>>, vector<1x16xf32>,
    %53 = vector.extract_strided_slice %48 {offsets = [2, 0], sizes = [1, 16], strides = [1, 1]} : vector<8x16xf32> to vector<1x16xf32>
    %c0_23 = arith.constant 0 : index
    %c32 = arith.constant 32 : index
    %54 = vector.load %arg15[%c0_23, %c32] : memref<2x128xf32, #tpu.memory_space<vmem>>, vector<1x16xf32>
    tpu.vector_store %arg15[%c0_23, %c32], %53 {strides = array<i32>} : memref<2x128xf32, #tpu.memory_space<vmem>>, vector<1x16xf32>,
    %55 = vector.extract_strided_slice %48 {offsets = [3, 0], sizes = [1, 16], strides = [1, 1]} : vector<8x16xf32> to vector<1x16xf32>
    %c0_24 = arith.constant 0 : index
    %c48 = arith.constant 48 : index
    %56 = vector.load %arg15[%c0_24, %c48] : memref<2x128xf32, #tpu.memory_space<vmem>>, vector<1x16xf32>
    tpu.vector_store %arg15[%c0_24, %c48], %55 {strides = array<i32>} : memref<2x128xf32, #tpu.memory_space<vmem>>, vector<1x16xf32>,
    %57 = vector.extract_strided_slice %48 {offsets = [4, 0], sizes = [1, 16], strides = [1, 1]} : vector<8x16xf32> to vector<1x16xf32>
    %c0_25 = arith.constant 0 : index
    %c64 = arith.constant 64 : index
    %58 = vector.load %arg15[%c0_25, %c64] : memref<2x128xf32, #tpu.memory_space<vmem>>, vector<1x16xf32>
    tpu.vector_store %arg15[%c0_25, %c64], %57 {strides = array<i32>} : memref<2x128xf32, #tpu.memory_space<vmem>>, vector<1x16xf32>,
    %59 = vector.extract_strided_slice %48 {offsets = [5, 0], sizes = [1, 16], strides = [1, 1]} : vector<8x16xf32> to vector<1x16xf32>
    %c0_26 = arith.constant 0 : index
    %c80 = arith.constant 80 : index
    %60 = vector.load %arg15[%c0_26, %c80] : memref<2x128xf32, #tpu.memory_space<vmem>>, vector<1x16xf32>
    tpu.vector_store %arg15[%c0_26, %c80], %59 {strides = array<i32>} : memref<2x128xf32, #tpu.memory_space<vmem>>, vector<1x16xf32>,
    %61 = vector.extract_strided_slice %48 {offsets = [6, 0], sizes = [1, 16], strides = [1, 1]} : vector<8x16xf32> to vector<1x16xf32>
    %c0_27 = arith.constant 0 : index
    %c96 = arith.constant 96 : index
    %62 = vector.load %arg15[%c0_27, %c96] : memref<2x128xf32, #tpu.memory_space<vmem>>, vector<1x16xf32>
    tpu.vector_store %arg15[%c0_27, %c96], %61 {strides = array<i32>} : memref<2x128xf32, #tpu.memory_space<vmem>>, vector<1x16xf32>,
    %63 = vector.extract_strided_slice %48 {offsets = [7, 0], sizes = [1, 16], strides = [1, 1]} : vector<8x16xf32> to vector<1x16xf32>
    %c0_28 = arith.constant 0 : index
    %c112 = arith.constant 112 : index
    %64 = vector.load %arg15[%c0_28, %c112] : memref<2x128xf32, #tpu.memory_space<vmem>>, vector<1x16xf32>
    tpu.vector_store %arg15[%c0_28, %c112], %63 {strides = array<i32>} : memref<2x128xf32, #tpu.memory_space<vmem>>, vector<1x16xf32>,
    %65 = vector.extract_strided_slice %31 {offsets = [0, 16], sizes = [8, 16], strides = [1, 1]} : vector<8x32xf32> to vector<8x16xf32>
    %66 = vector.extract_strided_slice %16 {offsets = [0, 16], sizes = [16, 16], strides = [1, 1]} : vector<16x32xf32> to vector<16x16xf32>
    %cst_29 = arith.constant dense<0.000000e+00> : vector<8x16xf32>
    %67 = tpu.matmul %65, %66, %cst_29 {dimension_numbers = #tpu.dot_dimension_numbers<[1], [1], [0], [0], [0, 0, 1, 0], [], []>} : vector<8x16xf32>, vector<16x16xf32>, vector<8x16xf32> -> vector<8x16xf32>
    %cst_30 = arith.constant dense<0.000000e+00> : vector<8xf32>
    %68 = vector.multi_reduction <add>, %65, %cst_30 [1] : vector<8x16xf32> to vector<8xf32>
    %69 = vector.shape_cast %68 : vector<8xf32> to vector<8x1xf32>
    %70 = vector.broadcast %69 : vector<8x1xf32> to vector<8x16xf32>
    %71 = arith.mulf %32, %70 : vector<8x16xf32>
    %72 = arith.subf %67, %71 : vector<8x16xf32>
    %73 = arith.mulf %72, %72 : vector<8x16xf32>
    %cst_31 = arith.constant dense<0.000000e+00> : vector<8xf32>
    %74 = vector.multi_reduction <add>, %73, %cst_31 [1] : vector<8x16xf32> to vector<8xf32>
    %75 = vector.shape_cast %74 : vector<8xf32> to vector<8x1xf32>
    %cst_32 = arith.constant 1.000000e-24 : f32
    %76 = vector.broadcast %cst_32 : f32 to vector<8x1xf32>
    %77 = arith.maximumf %75, %76 : vector<8x1xf32>
    %78 = math.rsqrt %77 : vector<8x1xf32>
    %79 = vector.broadcast %78 : vector<8x1xf32> to vector<8x16xf32>
    %80 = arith.mulf %72, %79 : vector<8x16xf32>
    %81 = vector.extract_strided_slice %80 {offsets = [0, 0], sizes = [1, 16], strides = [1, 1]} : vector<8x16xf32> to vector<1x16xf32>
    %c1 = arith.constant 1 : index
    %c0_33 = arith.constant 0 : index
    %82 = vector.load %arg15[%c1, %c0_33] : memref<2x128xf32, #tpu.memory_space<vmem>>, vector<1x16xf32>
    tpu.vector_store %arg15[%c1, %c0_33], %81 {strides = array<i32>} : memref<2x128xf32, #tpu.memory_space<vmem>>, vector<1x16xf32>,
    %83 = vector.extract_strided_slice %80 {offsets = [1, 0], sizes = [1, 16], strides = [1, 1]} : vector<8x16xf32> to vector<1x16xf32>
    %c1_34 = arith.constant 1 : index
    %c16_35 = arith.constant 16 : index
    %84 = vector.load %arg15[%c1_34, %c16_35] : memref<2x128xf32, #tpu.memory_space<vmem>>, vector<1x16xf32>
    tpu.vector_store %arg15[%c1_34, %c16_35], %83 {strides = array<i32>} : memref<2x128xf32, #tpu.memory_space<vmem>>, vector<1x16xf32>,
    %85 = vector.extract_strided_slice %80 {offsets = [2, 0], sizes = [1, 16], strides = [1, 1]} : vector<8x16xf32> to vector<1x16xf32>
    %c1_36 = arith.constant 1 : index
    %c32_37 = arith.constant 32 : index
    %86 = vector.load %arg15[%c1_36, %c32_37] : memref<2x128xf32, #tpu.memory_space<vmem>>, vector<1x16xf32>
    tpu.vector_store %arg15[%c1_36, %c32_37], %85 {strides = array<i32>} : memref<2x128xf32, #tpu.memory_space<vmem>>, vector<1x16xf32>,
    %87 = vector.extract_strided_slice %80 {offsets = [3, 0], sizes = [1, 16], strides = [1, 1]} : vector<8x16xf32> to vector<1x16xf32>
    %c1_38 = arith.constant 1 : index
    %c48_39 = arith.constant 48 : index
    %88 = vector.load %arg15[%c1_38, %c48_39] : memref<2x128xf32, #tpu.memory_space<vmem>>, vector<1x16xf32>
    tpu.vector_store %arg15[%c1_38, %c48_39], %87 {strides = array<i32>} : memref<2x128xf32, #tpu.memory_space<vmem>>, vector<1x16xf32>,
    %89 = vector.extract_strided_slice %80 {offsets = [4, 0], sizes = [1, 16], strides = [1, 1]} : vector<8x16xf32> to vector<1x16xf32>
    %c1_40 = arith.constant 1 : index
    %c64_41 = arith.constant 64 : index
    %90 = vector.load %arg15[%c1_40, %c64_41] : memref<2x128xf32, #tpu.memory_space<vmem>>, vector<1x16xf32>
    tpu.vector_store %arg15[%c1_40, %c64_41], %89 {strides = array<i32>} : memref<2x128xf32, #tpu.memory_space<vmem>>, vector<1x16xf32>,
    %91 = vector.extract_strided_slice %80 {offsets = [5, 0], sizes = [1, 16], strides = [1, 1]} : vector<8x16xf32> to vector<1x16xf32>
    %c1_42 = arith.constant 1 : index
    %c80_43 = arith.constant 80 : index
    %92 = vector.load %arg15[%c1_42, %c80_43] : memref<2x128xf32, #tpu.memory_space<vmem>>, vector<1x16xf32>
    tpu.vector_store %arg15[%c1_42, %c80_43], %91 {strides = array<i32>} : memref<2x128xf32, #tpu.memory_space<vmem>>, vector<1x16xf32>,
    %93 = vector.extract_strided_slice %80 {offsets = [6, 0], sizes = [1, 16], strides = [1, 1]} : vector<8x16xf32> to vector<1x16xf32>
    %c1_44 = arith.constant 1 : index
    %c96_45 = arith.constant 96 : index
    %94 = vector.load %arg15[%c1_44, %c96_45] : memref<2x128xf32, #tpu.memory_space<vmem>>, vector<1x16xf32>
    tpu.vector_store %arg15[%c1_44, %c96_45], %93 {strides = array<i32>} : memref<2x128xf32, #tpu.memory_space<vmem>>, vector<1x16xf32>,
    %95 = vector.extract_strided_slice %80 {offsets = [7, 0], sizes = [1, 16], strides = [1, 1]} : vector<8x16xf32> to vector<1x16xf32>
    %c1_46 = arith.constant 1 : index
    %c112_47 = arith.constant 112 : index
    %96 = vector.load %arg15[%c1_46, %c112_47] : memref<2x128xf32, #tpu.memory_space<vmem>>, vector<1x16xf32>
    tpu.vector_store %arg15[%c1_46, %c112_47], %95 {strides = array<i32>} : memref<2x128xf32, #tpu.memory_space<vmem>>, vector<1x16xf32>,
    %c0_48 = arith.constant 0 : index
    %c0_49 = arith.constant 0 : index
    %97 = vector.load %arg15[%c0_48, %c0_49] : memref<2x128xf32, #tpu.memory_space<vmem>>, vector<2x128xf32>
    %98 = arith.mulf %97, %97 : vector<2x128xf32>
    %cst_50 = arith.constant dense<0.000000e+00> : vector<2xf32>
    %99 = vector.multi_reduction <add>, %98, %cst_50 [1] : vector<2x128xf32> to vector<2xf32>
    %100 = vector.shape_cast %99 : vector<2xf32> to vector<2x1xf32>
    %c0_51 = arith.constant 0 : index
    %c0_52 = arith.constant 0 : index
    %101 = vector.load %arg6[%c0_51, %c0_52] : memref<128x32xf32, #tpu.memory_space<vmem>>, vector<128x32xf32>
    %cst_53 = arith.constant dense<0.000000e+00> : vector<2x32xf32>
    %102 = tpu.matmul %97, %101, %cst_53 {dimension_numbers = #tpu.dot_dimension_numbers<[1], [0], [0], [1], [0, 0, 1, 1], [], []>} : vector<2x128xf32>, vector<128x32xf32>, vector<2x32xf32> -> vector<2x32xf32>
    %cst_54 = arith.constant 1.000000e-24 : f32
    %103 = vector.broadcast %cst_54 : f32 to vector<2x1xf32>
    %104 = arith.maximumf %100, %103 : vector<2x1xf32>
    %105 = math.rsqrt %104 : vector<2x1xf32>
    %106 = vector.broadcast %105 : vector<2x1xf32> to vector<2x32xf32>
    %107 = arith.mulf %102, %106 : vector<2x32xf32>
    %c0_55 = arith.constant 0 : index
    %c0_56 = arith.constant 0 : index
    %108 = vector.load %arg7[%c0_55, %c0_56] : memref<1x32xf32, #tpu.memory_space<vmem>>, vector<1x32xf32>
    %109 = vector.broadcast %108 : vector<1x32xf32> to vector<2x32xf32>
    %110 = arith.addf %107, %109 : vector<2x32xf32>
    %c0_57 = arith.constant 0 : index
    %c0_58 = arith.constant 0 : index
    %111 = vector.load %arg8[%c0_57, %c0_58] : memref<8x16xf32, #tpu.memory_space<vmem>>, vector<8x16xf32>
    %c0_59 = arith.constant 0 : index
    %c0_60 = arith.constant 0 : index
    %112 = vector.load %arg10[%c0_59, %c0_60] : memref<32x32xf32, #tpu.memory_space<vmem>>, vector<32x32xf32>
    %c0_61 = arith.constant 0 : index
    %c0_62 = arith.constant 0 : index
    %113 = vector.load %arg12[%c0_61, %c0_62] : memref<32x16xf32, #tpu.memory_space<vmem>>, vector<32x16xf32>
    %c0_63 = arith.constant 0 : index
    %c0_64 = arith.constant 0 : index
    %114 = vector.load %arg13[%c0_63, %c0_64] : memref<1x16xf32, #tpu.memory_space<vmem>>, vector<1x16xf32>
    %c0_65 = arith.constant 0 : index
    %c0_66 = arith.constant 0 : index
    %115 = vector.load %arg9[%c0_65, %c0_66] : memref<16x32xf32, #tpu.memory_space<vmem>>, vector<16x32xf32>
    %cst_67 = arith.constant dense<0.000000e+00> : vector<8x32xf32>
    %116 = tpu.matmul %111, %115, %cst_67 {dimension_numbers = #tpu.dot_dimension_numbers<[1], [0], [0], [1], [0, 0, 1, 1], [], []>} : vector<8x16xf32>, vector<16x32xf32>, vector<8x32xf32> -> vector<8x32xf32>
    %c0_68 = arith.constant 0 : index
    %c0_69 = arith.constant 0 : index
    %117 = vector.load %arg11[%c0_68, %c0_69] : memref<1x32xf32, #tpu.memory_space<vmem>>, vector<1x32xf32>
    %118 = vector.broadcast %117 : vector<1x32xf32> to vector<8x32xf32>
    %119 = arith.addf %116, %118 : vector<8x32xf32>
    %120 = vector.extract_strided_slice %110 {offsets = [0, 0], sizes = [1, 32], strides = [1, 1]} : vector<2x32xf32> to vector<1x32xf32>
    %cst_70 = arith.constant 0.000000e+00 : f32
    %121 = vector.broadcast %cst_70 : f32 to vector<1x1xf32>
    %122 = vector.extract_strided_slice %119 {offsets = [0, 0], sizes = [1, 32], strides = [1, 1]} : vector<8x32xf32> to vector<1x32xf32>
    %cst_71 = arith.constant dense<0.000000e+00> : vector<1x32xf32>
    %123 = tpu.matmul %120, %112, %cst_71 {dimension_numbers = #tpu.dot_dimension_numbers<[1], [0], [0], [1], [0, 0, 1, 1], [], []>} : vector<1x32xf32>, vector<32x32xf32>, vector<1x32xf32> -> vector<1x32xf32>
    %124 = arith.addf %122, %123 : vector<1x32xf32>
    %cst_72 = arith.constant 0.000000e+00 : f32
    %125 = vector.broadcast %cst_72 : f32 to vector<1x32xf32>
    %126 = arith.subf %125, %124 : vector<1x32xf32>
    %127 = math.exp %126 : vector<1x32xf32>
    %cst_73 = arith.constant 1.000000e+00 : f32
    %128 = vector.broadcast %cst_73 : f32 to vector<1x32xf32>
    %129 = arith.addf %128, %127 : vector<1x32xf32>
    %130 = tpu.reciprocal %129 {approx = true} : vector<1x32xf32> -> vector<1x32xf32>
    %cst_74 = arith.constant dense<0.000000e+00> : vector<1x16xf32>
    %131 = tpu.matmul %130, %113, %cst_74 {dimension_numbers = #tpu.dot_dimension_numbers<[1], [0], [0], [1], [0, 0, 1, 1], [], []>} : vector<1x32xf32>, vector<32x16xf32>, vector<1x16xf32> -> vector<1x16xf32>
    %132 = arith.addf %131, %114 : vector<1x16xf32>
    %cst_75 = arith.constant 0.000000e+00 : f32
    %133 = vector.broadcast %cst_75 : f32 to vector<1x16xf32>
    %134 = arith.subf %133, %132 : vector<1x16xf32>
    %135 = math.exp %134 : vector<1x16xf32>
    %cst_76 = arith.constant 1.000000e+00 : f32
    %136 = vector.broadcast %cst_76 : f32 to vector<1x16xf32>
    %137 = arith.addf %136, %135 : vector<1x16xf32>
    %138 = tpu.reciprocal %137 {approx = true} : vector<1x16xf32> -> vector<1x16xf32>
    %139 = vector.extract_strided_slice %111 {offsets = [1, 0], sizes = [1, 16], strides = [1, 1]} : vector<8x16xf32> to vector<1x16xf32>
    %140 = arith.subf %138, %139 : vector<1x16xf32>
    %141 = arith.mulf %140, %140 : vector<1x16xf32>
    %142 = vector.shape_cast %141 : vector<1x16xf32> to vector<1x1x16xf32>
    %cst_77 = arith.constant dense<0.000000e+00> : vector<1xf32>
    %143 = vector.multi_reduction <add>, %142, %cst_77 [1, 2] : vector<1x1x16xf32> to vector<1xf32>
    %144 = vector.shape_cast %143 : vector<1xf32> to vector<1x1x1xf32>
    %145 = vector.extract %144[0, 0, 0] : f32 from vector<1x1x1xf32>
    %146 = vector.broadcast %145 : f32 to vector<1x1xf32>
    %147 = arith.addf %121, %146 : vector<1x1xf32>
    %148 = vector.extract_strided_slice %119 {offsets = [1, 0], sizes = [1, 32], strides = [1, 1]} : vector<8x32xf32> to vector<1x32xf32>
    %cst_78 = arith.constant dense<0.000000e+00> : vector<1x32xf32>
    %149 = tpu.matmul %130, %112, %cst_78 {dimension_numbers = #tpu.dot_dimension_numbers<[1], [0], [0], [1], [0, 0, 1, 1], [], []>} : vector<1x32xf32>, vector<32x32xf32>, vector<1x32xf32> -> vector<1x32xf32>
    %150 = arith.addf %148, %149 : vector<1x32xf32>
    %cst_79 = arith.constant 0.000000e+00 : f32
    %151 = vector.broadcast %cst_79 : f32 to vector<1x32xf32>
    %152 = arith.subf %151, %150 : vector<1x32xf32>
    %153 = math.exp %152 : vector<1x32xf32>
    %cst_80 = arith.constant 1.000000e+00 : f32
    %154 = vector.broadcast %cst_80 : f32 to vector<1x32xf32>
    %155 = arith.addf %154, %153 : vector<1x32xf32>
    %156 = tpu.reciprocal %155 {approx = true} : vector<1x32xf32> -> vector<1x32xf32>
    %cst_81 = arith.constant dense<0.000000e+00> : vector<1x16xf32>
    %157 = tpu.matmul %156, %113, %cst_81 {dimension_numbers = #tpu.dot_dimension_numbers<[1], [0], [0], [1], [0, 0, 1, 1], [], []>} : vector<1x32xf32>, vector<32x16xf32>, vector<1x16xf32> -> vector<1x16xf32>
    %158 = arith.addf %157, %114 : vector<1x16xf32>
    %cst_82 = arith.constant 0.000000e+00 : f32
    %159 = vector.broadcast %cst_82 : f32 to vector<1x16xf32>
    %160 = arith.subf %159, %158 : vector<1x16xf32>
    %161 = math.exp %160 : vector<1x16xf32>
    %cst_83 = arith.constant 1.000000e+00 : f32
    %162 = vector.broadcast %cst_83 : f32 to vector<1x16xf32>
    %163 = arith.addf %162, %161 : vector<1x16xf32>
    %164 = tpu.reciprocal %163 {approx = true} : vector<1x16xf32> -> vector<1x16xf32>
    %165 = vector.extract_strided_slice %111 {offsets = [2, 0], sizes = [1, 16], strides = [1, 1]} : vector<8x16xf32> to vector<1x16xf32>
    %166 = arith.subf %164, %165 : vector<1x16xf32>
    %167 = arith.mulf %166, %166 : vector<1x16xf32>
    %168 = vector.shape_cast %167 : vector<1x16xf32> to vector<1x1x16xf32>
    %cst_84 = arith.constant dense<0.000000e+00> : vector<1xf32>
    %169 = vector.multi_reduction <add>, %168, %cst_84 [1, 2] : vector<1x1x16xf32> to vector<1xf32>
    %170 = vector.shape_cast %169 : vector<1xf32> to vector<1x1x1xf32>
    %171 = vector.extract %170[0, 0, 0] : f32 from vector<1x1x1xf32>
    %172 = vector.broadcast %171 : f32 to vector<1x1xf32>
    %173 = arith.addf %147, %172 : vector<1x1xf32>
    %174 = vector.extract_strided_slice %119 {offsets = [2, 0], sizes = [1, 32], strides = [1, 1]} : vector<8x32xf32> to vector<1x32xf32>
    %cst_85 = arith.constant dense<0.000000e+00> : vector<1x32xf32>
    %175 = tpu.matmul %156, %112, %cst_85 {dimension_numbers = #tpu.dot_dimension_numbers<[1], [0], [0], [1], [0, 0, 1, 1], [], []>} : vector<1x32xf32>, vector<32x32xf32>, vector<1x32xf32> -> vector<1x32xf32>
    %176 = arith.addf %174, %175 : vector<1x32xf32>
    %cst_86 = arith.constant 0.000000e+00 : f32
    %177 = vector.broadcast %cst_86 : f32 to vector<1x32xf32>
    %178 = arith.subf %177, %176 : vector<1x32xf32>
    %179 = math.exp %178 : vector<1x32xf32>
    %cst_87 = arith.constant 1.000000e+00 : f32
    %180 = vector.broadcast %cst_87 : f32 to vector<1x32xf32>
    %181 = arith.addf %180, %179 : vector<1x32xf32>
    %182 = tpu.reciprocal %181 {approx = true} : vector<1x32xf32> -> vector<1x32xf32>
    %cst_88 = arith.constant dense<0.000000e+00> : vector<1x16xf32>
    %183 = tpu.matmul %182, %113, %cst_88 {dimension_numbers = #tpu.dot_dimension_numbers<[1], [0], [0], [1], [0, 0, 1, 1], [], []>} : vector<1x32xf32>, vector<32x16xf32>, vector<1x16xf32> -> vector<1x16xf32>
    %184 = arith.addf %183, %114 : vector<1x16xf32>
    %cst_89 = arith.constant 0.000000e+00 : f32
    %185 = vector.broadcast %cst_89 : f32 to vector<1x16xf32>
    %186 = arith.subf %185, %184 : vector<1x16xf32>
    %187 = math.exp %186 : vector<1x16xf32>
    %cst_90 = arith.constant 1.000000e+00 : f32
    %188 = vector.broadcast %cst_90 : f32 to vector<1x16xf32>
    %189 = arith.addf %188, %187 : vector<1x16xf32>
    %190 = tpu.reciprocal %189 {approx = true} : vector<1x16xf32> -> vector<1x16xf32>
    %191 = vector.extract_strided_slice %111 {offsets = [3, 0], sizes = [1, 16], strides = [1, 1]} : vector<8x16xf32> to vector<1x16xf32>
    %192 = arith.subf %190, %191 : vector<1x16xf32>
    %193 = arith.mulf %192, %192 : vector<1x16xf32>
    %194 = vector.shape_cast %193 : vector<1x16xf32> to vector<1x1x16xf32>
    %cst_91 = arith.constant dense<0.000000e+00> : vector<1xf32>
    %195 = vector.multi_reduction <add>, %194, %cst_91 [1, 2] : vector<1x1x16xf32> to vector<1xf32>
    %196 = vector.shape_cast %195 : vector<1xf32> to vector<1x1x1xf32>
    %197 = vector.extract %196[0, 0, 0] : f32 from vector<1x1x1xf32>
    %198 = vector.broadcast %197 : f32 to vector<1x1xf32>
    %199 = arith.addf %173, %198 : vector<1x1xf32>
    %200 = vector.extract_strided_slice %119 {offsets = [3, 0], sizes = [1, 32], strides = [1, 1]} : vector<8x32xf32> to vector<1x32xf32>
    %cst_92 = arith.constant dense<0.000000e+00> : vector<1x32xf32>
    %201 = tpu.matmul %182, %112, %cst_92 {dimension_numbers = #tpu.dot_dimension_numbers<[1], [0], [0], [1], [0, 0, 1, 1], [], []>} : vector<1x32xf32>, vector<32x32xf32>, vector<1x32xf32> -> vector<1x32xf32>
    %202 = arith.addf %200, %201 : vector<1x32xf32>
    %cst_93 = arith.constant 0.000000e+00 : f32
    %203 = vector.broadcast %cst_93 : f32 to vector<1x32xf32>
    %204 = arith.subf %203, %202 : vector<1x32xf32>
    %205 = math.exp %204 : vector<1x32xf32>
    %cst_94 = arith.constant 1.000000e+00 : f32
    %206 = vector.broadcast %cst_94 : f32 to vector<1x32xf32>
    %207 = arith.addf %206, %205 : vector<1x32xf32>
    %208 = tpu.reciprocal %207 {approx = true} : vector<1x32xf32> -> vector<1x32xf32>
    %cst_95 = arith.constant dense<0.000000e+00> : vector<1x16xf32>
    %209 = tpu.matmul %208, %113, %cst_95 {dimension_numbers = #tpu.dot_dimension_numbers<[1], [0], [0], [1], [0, 0, 1, 1], [], []>} : vector<1x32xf32>, vector<32x16xf32>, vector<1x16xf32> -> vector<1x16xf32>
    %210 = arith.addf %209, %114 : vector<1x16xf32>
    %cst_96 = arith.constant 0.000000e+00 : f32
    %211 = vector.broadcast %cst_96 : f32 to vector<1x16xf32>
    %212 = arith.subf %211, %210 : vector<1x16xf32>
    %213 = math.exp %212 : vector<1x16xf32>
    %cst_97 = arith.constant 1.000000e+00 : f32
    %214 = vector.broadcast %cst_97 : f32 to vector<1x16xf32>
    %215 = arith.addf %214, %213 : vector<1x16xf32>
    %216 = tpu.reciprocal %215 {approx = true} : vector<1x16xf32> -> vector<1x16xf32>
    %217 = vector.extract_strided_slice %111 {offsets = [4, 0], sizes = [1, 16], strides = [1, 1]} : vector<8x16xf32> to vector<1x16xf32>
    %218 = arith.subf %216, %217 : vector<1x16xf32>
    %219 = arith.mulf %218, %218 : vector<1x16xf32>
    %220 = vector.shape_cast %219 : vector<1x16xf32> to vector<1x1x16xf32>
    %cst_98 = arith.constant dense<0.000000e+00> : vector<1xf32>
    %221 = vector.multi_reduction <add>, %220, %cst_98 [1, 2] : vector<1x1x16xf32> to vector<1xf32>
    %222 = vector.shape_cast %221 : vector<1xf32> to vector<1x1x1xf32>
    %223 = vector.extract %222[0, 0, 0] : f32 from vector<1x1x1xf32>
    %224 = vector.broadcast %223 : f32 to vector<1x1xf32>
    %225 = arith.addf %199, %224 : vector<1x1xf32>
    %226 = vector.extract_strided_slice %119 {offsets = [4, 0], sizes = [1, 32], strides = [1, 1]} : vector<8x32xf32> to vector<1x32xf32>
    %cst_99 = arith.constant dense<0.000000e+00> : vector<1x32xf32>
    %227 = tpu.matmul %208, %112, %cst_99 {dimension_numbers = #tpu.dot_dimension_numbers<[1], [0], [0], [1], [0, 0, 1, 1], [], []>} : vector<1x32xf32>, vector<32x32xf32>, vector<1x32xf32> -> vector<1x32xf32>
    %228 = arith.addf %226, %227 : vector<1x32xf32>
    %cst_100 = arith.constant 0.000000e+00 : f32
    %229 = vector.broadcast %cst_100 : f32 to vector<1x32xf32>
    %230 = arith.subf %229, %228 : vector<1x32xf32>
    %231 = math.exp %230 : vector<1x32xf32>
    %cst_101 = arith.constant 1.000000e+00 : f32
    %232 = vector.broadcast %cst_101 : f32 to vector<1x32xf32>
    %233 = arith.addf %232, %231 : vector<1x32xf32>
    %234 = tpu.reciprocal %233 {approx = true} : vector<1x32xf32> -> vector<1x32xf32>
    %cst_102 = arith.constant dense<0.000000e+00> : vector<1x16xf32>
    %235 = tpu.matmul %234, %113, %cst_102 {dimension_numbers = #tpu.dot_dimension_numbers<[1], [0], [0], [1], [0, 0, 1, 1], [], []>} : vector<1x32xf32>, vector<32x16xf32>, vector<1x16xf32> -> vector<1x16xf32>
    %236 = arith.addf %235, %114 : vector<1x16xf32>
    %cst_103 = arith.constant 0.000000e+00 : f32
    %237 = vector.broadcast %cst_103 : f32 to vector<1x16xf32>
    %238 = arith.subf %237, %236 : vector<1x16xf32>
    %239 = math.exp %238 : vector<1x16xf32>
    %cst_104 = arith.constant 1.000000e+00 : f32
    %240 = vector.broadcast %cst_104 : f32 to vector<1x16xf32>
    %241 = arith.addf %240, %239 : vector<1x16xf32>
    %242 = tpu.reciprocal %241 {approx = true} : vector<1x16xf32> -> vector<1x16xf32>
    %243 = vector.extract_strided_slice %111 {offsets = [5, 0], sizes = [1, 16], strides = [1, 1]} : vector<8x16xf32> to vector<1x16xf32>
    %244 = arith.subf %242, %243 : vector<1x16xf32>
    %245 = arith.mulf %244, %244 : vector<1x16xf32>
    %246 = vector.shape_cast %245 : vector<1x16xf32> to vector<1x1x16xf32>
    %cst_105 = arith.constant dense<0.000000e+00> : vector<1xf32>
    %247 = vector.multi_reduction <add>, %246, %cst_105 [1, 2] : vector<1x1x16xf32> to vector<1xf32>
    %248 = vector.shape_cast %247 : vector<1xf32> to vector<1x1x1xf32>
    %249 = vector.extract %248[0, 0, 0] : f32 from vector<1x1x1xf32>
    %250 = vector.broadcast %249 : f32 to vector<1x1xf32>
    %251 = arith.addf %225, %250 : vector<1x1xf32>
    %252 = vector.extract_strided_slice %119 {offsets = [5, 0], sizes = [1, 32], strides = [1, 1]} : vector<8x32xf32> to vector<1x32xf32>
    %cst_106 = arith.constant dense<0.000000e+00> : vector<1x32xf32>
    %253 = tpu.matmul %234, %112, %cst_106 {dimension_numbers = #tpu.dot_dimension_numbers<[1], [0], [0], [1], [0, 0, 1, 1], [], []>} : vector<1x32xf32>, vector<32x32xf32>, vector<1x32xf32> -> vector<1x32xf32>
    %254 = arith.addf %252, %253 : vector<1x32xf32>
    %cst_107 = arith.constant 0.000000e+00 : f32
    %255 = vector.broadcast %cst_107 : f32 to vector<1x32xf32>
    %256 = arith.subf %255, %254 : vector<1x32xf32>
    %257 = math.exp %256 : vector<1x32xf32>
    %cst_108 = arith.constant 1.000000e+00 : f32
    %258 = vector.broadcast %cst_108 : f32 to vector<1x32xf32>
    %259 = arith.addf %258, %257 : vector<1x32xf32>
    %260 = tpu.reciprocal %259 {approx = true} : vector<1x32xf32> -> vector<1x32xf32>
    %cst_109 = arith.constant dense<0.000000e+00> : vector<1x16xf32>
    %261 = tpu.matmul %260, %113, %cst_109 {dimension_numbers = #tpu.dot_dimension_numbers<[1], [0], [0], [1], [0, 0, 1, 1], [], []>} : vector<1x32xf32>, vector<32x16xf32>, vector<1x16xf32> -> vector<1x16xf32>
    %262 = arith.addf %261, %114 : vector<1x16xf32>
    %cst_110 = arith.constant 0.000000e+00 : f32
    %263 = vector.broadcast %cst_110 : f32 to vector<1x16xf32>
    %264 = arith.subf %263, %262 : vector<1x16xf32>
    %265 = math.exp %264 : vector<1x16xf32>
    %cst_111 = arith.constant 1.000000e+00 : f32
    %266 = vector.broadcast %cst_111 : f32 to vector<1x16xf32>
    %267 = arith.addf %266, %265 : vector<1x16xf32>
    %268 = tpu.reciprocal %267 {approx = true} : vector<1x16xf32> -> vector<1x16xf32>
    %269 = vector.extract_strided_slice %111 {offsets = [6, 0], sizes = [1, 16], strides = [1, 1]} : vector<8x16xf32> to vector<1x16xf32>
    %270 = arith.subf %268, %269 : vector<1x16xf32>
    %271 = arith.mulf %270, %270 : vector<1x16xf32>
    %272 = vector.shape_cast %271 : vector<1x16xf32> to vector<1x1x16xf32>
    %cst_112 = arith.constant dense<0.000000e+00> : vector<1xf32>
    %273 = vector.multi_reduction <add>, %272, %cst_112 [1, 2] : vector<1x1x16xf32> to vector<1xf32>
    %274 = vector.shape_cast %273 : vector<1xf32> to vector<1x1x1xf32>
    %275 = vector.extract %274[0, 0, 0] : f32 from vector<1x1x1xf32>
    %276 = vector.broadcast %275 : f32 to vector<1x1xf32>
    %277 = arith.addf %251, %276 : vector<1x1xf32>
    %278 = vector.extract_strided_slice %119 {offsets = [6, 0], sizes = [1, 32], strides = [1, 1]} : vector<8x32xf32> to vector<1x32xf32>
    %cst_113 = arith.constant dense<0.000000e+00> : vector<1x32xf32>
    %279 = tpu.matmul %260, %112, %cst_113 {dimension_numbers = #tpu.dot_dimension_numbers<[1], [0], [0], [1], [0, 0, 1, 1], [], []>} : vector<1x32xf32>, vector<32x32xf32>, vector<1x32xf32> -> vector<1x32xf32>
    %280 = arith.addf %278, %279 : vector<1x32xf32>
    %cst_114 = arith.constant 0.000000e+00 : f32
    %281 = vector.broadcast %cst_114 : f32 to vector<1x32xf32>
    %282 = arith.subf %281, %280 : vector<1x32xf32>
    %283 = math.exp %282 : vector<1x32xf32>
    %cst_115 = arith.constant 1.000000e+00 : f32
    %284 = vector.broadcast %cst_115 : f32 to vector<1x32xf32>
    %285 = arith.addf %284, %283 : vector<1x32xf32>
    %286 = tpu.reciprocal %285 {approx = true} : vector<1x32xf32> -> vector<1x32xf32>
    %cst_116 = arith.constant dense<0.000000e+00> : vector<1x16xf32>
    %287 = tpu.matmul %286, %113, %cst_116 {dimension_numbers = #tpu.dot_dimension_numbers<[1], [0], [0], [1], [0, 0, 1, 1], [], []>} : vector<1x32xf32>, vector<32x16xf32>, vector<1x16xf32> -> vector<1x16xf32>
    %288 = arith.addf %287, %114 : vector<1x16xf32>
    %cst_117 = arith.constant 0.000000e+00 : f32
    %289 = vector.broadcast %cst_117 : f32 to vector<1x16xf32>
    %290 = arith.subf %289, %288 : vector<1x16xf32>
    %291 = math.exp %290 : vector<1x16xf32>
    %cst_118 = arith.constant 1.000000e+00 : f32
    %292 = vector.broadcast %cst_118 : f32 to vector<1x16xf32>
    %293 = arith.addf %292, %291 : vector<1x16xf32>
    %294 = tpu.reciprocal %293 {approx = true} : vector<1x16xf32> -> vector<1x16xf32>
    %295 = vector.extract_strided_slice %111 {offsets = [7, 0], sizes = [1, 16], strides = [1, 1]} : vector<8x16xf32> to vector<1x16xf32>
    %296 = arith.subf %294, %295 : vector<1x16xf32>
    %297 = arith.mulf %296, %296 : vector<1x16xf32>
    %298 = vector.shape_cast %297 : vector<1x16xf32> to vector<1x1x16xf32>
    %cst_119 = arith.constant dense<0.000000e+00> : vector<1xf32>
    %299 = vector.multi_reduction <add>, %298, %cst_119 [1, 2] : vector<1x1x16xf32> to vector<1xf32>
    %300 = vector.shape_cast %299 : vector<1xf32> to vector<1x1x1xf32>
    %301 = vector.extract %300[0, 0, 0] : f32 from vector<1x1x1xf32>
    %302 = vector.broadcast %301 : f32 to vector<1x1xf32>
    %303 = arith.addf %277, %302 : vector<1x1xf32>
    %cst_120 = arith.constant 7.812500e-03 : f32
    %304 = vector.broadcast %cst_120 : f32 to vector<1x1xf32>
    %305 = arith.mulf %303, %304 : vector<1x1xf32>
    %c0_121 = arith.constant 0 : index
    %c0_122 = arith.constant 0 : index
    %306 = vector.load %arg14[%c0_121, %c0_122] : memref<1x1xf32, #tpu.memory_space<vmem>>, vector<1x1xf32>
    tpu.vector_store %arg14[%c0_121, %c0_122], %305 {strides = array<i32>} : memref<1x1xf32, #tpu.memory_space<vmem>>, vector<1x1xf32>,
    return
  }
}

</mosaic_0001>

<bundles_post_ra>
// kernel: imgcap_forward.2
= control target key start
LH: loop header
LB: loop body
LE: loop exit
PB: predicated region body
PF: predicated region fallthrough
CT: control target
= control target key end

     0   :  { %vm70_vm0 = vcmask 1044480   ;;  %vm71_vm1 = vcmask 1045504   ;;  %v206_v1 = vmov 0   ;;  %v207_v2 = vmov 65535   ;;  %s261_s0 = inlined_call_operand.vmem [shape: bf16[27,512], index: 0, kind: input, shape index: {}]   ;;  %s262_s2 = inlined_call_operand.vmem [shape: f32[4,1], index: 2, kind: input, shape index: {}]   ;;  %s263_s1 = inlined_call_operand.vmem [shape: bf16[4,27], index: 1, kind: input, shape index: {}]   ;;  %s264_s3 = inlined_call_operand.vmem [shape: f32[4,128], index: 3, kind: output, shape index: {}]  }
   0x1   :  { %v194_v0 = vld [vmem:[%s261_s0 + $0x24] ss:$16 sps:$4 sm:$0x3f]   ;;  %118 = vmatprep.mubr.bf16.mxu0 %v206_v1  ;;  %159 = vmatprep.mubr.bf16.mxu1 %v206_v1  ;;  %v72_v3 = vsel %vm70_vm0, 4294967295, %v207_v2  ;;  %v202_v11 = vld [vmem:[%s261_s0 + $0xc] ss:$16 sps:$4 sm:$0xff]  }
   0x2   :  { %193 = vset.pattern.permute.xlu0 %v206_v1  ;;  %v73_v4 = vsel %vm71_vm1, %v72_v3, 0  ;;  %v196_v5 = vld [vmem:[%s261_s0 + $0x2c] ss:$16 sps:$4 sm:$0x3f]   ;;  %v200_v10 = vld [vmem:[%s261_s0 + $0x4] ss:$16 sps:$4 sm:$0xff]  }
   0x3   :  { %v78_v6 = vand.u32 %v194_v0, %v73_v4  ;;  %v198_v7 = vld [vmem:[%s261_s0 + $0x20] ss:$16 sps:$4 sm:$0x3f]   ;;  %v199_v8 = vld [vmem:[%s261_s0 + $0x28] ss:$16 sps:$4 sm:$0x3f]   ;;  %v84_v9 = vand.u32 %v196_v5, %v73_v4 }
   0x4   :  { %v75_v12 = vand.u32 %v198_v7, %v73_v4  ;;  %v81_v13 = vand.u32 %v199_v8, %v73_v4  ;;  %v24_v14 = vld [vmem:[%s262_s2] sm:$0xf]  ;;  %v205_v16 = vld [vmem:[%s261_s0 + $0x8] ss:$16 sps:$4 sm:$0xff]   ;;  %vm66_vm2 = vcmask 220160  }
   0x5   :  { %98 = vmatprep.subr.bf16.mxu0 %v78_v6  ;;  %139 = vmatprep.subr.bf16.mxu1 %v84_v9  ;;  %v204_v15 = vld [vmem:[%s261_s0] ss:$16 sps:$4 sm:$0xff]  }
   0x6   :  { %99 = vmatpush1.bf16.msra.mxu0 %v75_v12  ;;  %140 = vmatpush1.bf16.msra.mxu1 %v81_v13  ;;  %v15_v17 = vld [vmem:[%s263_s1] sm:$0x3] }
   0x7   :  { %100 = vmatprep.subr.bf16.mxu0 %v200_v10  ;;  %141 = vmatprep.subr.bf16.mxu1 %v202_v11 }
   0x8   :  { %27 = vperm.xlu0 %193, %v24_v14  }
   0xa   :  { %101 = vmatpush1.bf16.msra.mxu0 %v204_v15  ;;  %142 = vmatpush1.bf16.msra.mxu1 %v205_v16 }
   0xd   :  { %189 = vmatmul.mubr.msk.bf16.vlgmr.msra.gmra.mxu0 %vm66_vm2, %v15_v17  ;;  %190 = vmatmul.mubr.msk.bf16.vlgmr.msra.gmra.mxu1 %vm66_vm2, %v15_v17 }
  0x83   :  { %v28_v18 = vpop.permute.xlu0 %27 }
  0xcd   :  { %v120_v19 = vpop.f32.mrf.mxu0  ;;  %v161_v20 = vpop.f32.mrf.mxu1 }
  0xce   :  { %v121_v21 = vadd.f32 %v120_v19, %v28_v18  ;;  %v162_v24 = vadd.f32 %v161_v20, %v28_v18 }
  0xcf   :  { %v122_v22 = vpop.f32.mrf.mxu0  ;;  %v163_v23 = vpop.f32.mrf.mxu1 }
  0xd0   :  { %v123_v25 = vadd.f32 %v122_v22, %v28_v18  ;;  %v168_v28 = vmax.f32 %v121_v21, 0.0  ;;  %v164_v30 = vadd.f32 %v163_v23, %v28_v18  ;;  %v170_v33 = vmax.f32 %v162_v24, 0.0 }
  0xd1   :  { %v124_v26 = vpop.f32.mrf.mxu0  ;;  %v165_v27 = vpop.f32.mrf.mxu1 }
  0xd2   :  { %v169_v29 = vmax.f32 %v123_v25, 0.0  ;;  %v171_v35 = vmax.f32 %v164_v30, 0.0 }
  0xd3   :  { %v125_v31 = vpop.f32.mrf.mxu0  ;;  %v166_v32 = vpop.f32.mrf.mxu1 }
  0xd4   :  { %v172_v34 = vadd.f32 %v169_v29, %v168_v28 }
  0xd6   :  { %v173_v36 = vadd.f32 %v172_v34, %v170_v33 }
  0xd8   :  { %v174_v37 = vadd.f32 %v173_v36, %v171_v35 }
  0xda   :  { %v175_v38 = vmul.f32 0.25, %v174_v37 }
  0xdc   :  { %176 = vst [vmem:[%s264_s3] sm:$0xf] %v175_v38 }

// kernel: imgcap_forward.3
= control target key start
LH: loop header
LB: loop body
LE: loop exit
PB: predicated region body
PF: predicated region fallthrough
CT: control target
= control target key end

     0   :  { %v2428_v1 = vmov 0.0   ;;  %vm92_vm0 = vcmask 1041408   ;;  %vm2429_vm1 = vmmov 0   ;;  %s2939_s0 = inlined_call_operand.vmem [shape: bf16[36,128], index: 0, kind: input, shape index: {}]   ;;  %s2940_s1 = inlined_call_operand.vmem [shape: bf16[16,36], index: 1, kind: input, shape index: {}]   ;;  %s2941_s2 = inlined_call_operand.vmem [shape: f32[16,1], index: 2, kind: input, shape index: {}]   ;;  %s2942_s3 = inlined_call_operand.vmem [shape: f32[8,16], index: 3, kind: input, shape index: {}]   ;;  %s2943_s4 = inlined_call_operand.vmem [shape: f32[8,16], index: 4, kind: input, shape index: {}]   ;;  %s2944_s5 = inlined_call_operand.vmem [shape: f32[8,1], index: 5, kind: input, shape index: {}]   ;;  %s2945_s6 = inlined_call_operand.vmem [shape: f32[128,32], index: 6, kind: input, shape index: {}]   ;;  %s2946_s7 = inlined_call_operand.vmem [shape: f32[1,32], index: 7, kind: input, shape index: {}]   ;;  %s2947_s8 = inlined_call_operand.vmem [shape: f32[8,16], index: 8, kind: input, shape index: {}]   ;;  %s2948_s9 = inlined_call_operand.vmem [shape: f32[16,32], index: 9, kind: input, shape index: {}]   ;;  %s2949_s10 = inlined_call_operand.vmem [shape: f32[32,32], index: 10, kind: input, shape index: {}]   ;;  %s2950_s11 = inlined_call_operand.vmem [shape: f32[1,32], index: 11, kind: input, shape index: {}]   ;;  %s2951_s12 = inlined_call_operand.vmem [shape: f32[32,16], index: 12, kind: input, shape index: {}]   ;;  %s2952_s13 = inlined_call_operand.vmem [shape: f32[1,16], index: 13, kind: input, shape index: {}]   ;;  %s2953_s14 = inlined_call_operand.hbm [shape: f32[1,1], index: 14, kind: output, shape index: {}]  }
   0x1   :  { %v2336_v0 = vld [vmem:[%s2939_s0 + $0x10] ss:$0 sps:$4 sm:$0x33]   ;;  %2083 = vmatprep.subr.bf16.mxu0 %v2428_v1  ;;  %2093 = vmatprep.subr.mxu1 %v2428_v1  ;;  %v2337_v3 = vld [vmem:[%s2939_s0 + $0x8] sm:$0xff]  }
   0x2   :  { %v94_v2 = vsel %vm92_vm0, %v2336_v0, 0  ;;  %2089 = vmatprep.mubr.msk.bf16.mxu0 %vm2429_vm1, %v2428_v1  ;;  %v57_v4 = vld [vmem:[%s2941_s2 + $0x8] sm:$0xff] }
   0x3   :  { %2084 = vmatpush3.bf16.msra.mxu0 %v94_v2 }
   0x4   :  { %2085 = vmatprep.subr.bf16.mxu0 %v2428_v1 }
   0x5   :  { %19 = vsyncpa [#allocation4], 0  ;;  %v2430_v5 = vmov 0   ;;  %2097 = vmatprep.mubr.msk.f32.mxu1 %vm2429_vm1, %v2428_v1  ;;  %v2338_v6 = vld [vmem:[%s2939_s0] sm:$0xff]   ;;  %vm88_vm2 = vcmask 293888   ;;  %s2431_s0 = smov 96  }
   0x6   :  { %2335 = vset.pattern.permute.xlu0 %v2430_v5  ;;  %v56_v7 = vld [vmem:[%s2941_s2] sm:$0xff]  ;;  %s2433_s2 = smov 32   ;;  %s2434_s27 = smov 112   ;;  %vm174_vm3 = vcmask 130048   ;;  %vm248_vm4 = vcmask 261120   ;;  %vm360_vm5 = vcmask 122880  }
   0x7   :  { %65 = vperm.xlu0 %2335, %v57_v4   ;;  %2086 = vmatpush3.bf16.msra.mxu0 %v2337_v3  ;;  %v2339_v8 = vld [vmem:[%s2940_s1] sm:$0xff]   ;;  %s2432_s1 = smov 64   ;;  %s2436_s30 = smov 48   ;;  %vm366_vm6 = vcmask 255105   ;;  %vm371_vm7 = vcmask 387330   ;;  %vm376_vm8 = vcmask 519555  }
   0x8   :  { %2087 = vmatprep.subr.bf16.mxu0 %v2428_v1  ;;  %v168_v19 = vld [vmem:[%s2944_s5] sm:$0xff]  ;;  %s2437_s19 = smov 80   ;;  %vm381_vm9 = vcmask 651780   ;;  %vm386_vm10 = vcmask 784005   ;;  %vm391_vm11 = vcmask 916230   ;;  %vm396_vm12 = vcmask 1048455  }
   0x9   :  { %v167_v34 = vld [vmem:[%s2943_s4] sm:$0xff]  ;;  %s2438_s29 = smov [#allocation3]   ;;  %vm1935_vm13 = vcmask 0  }
   0xa   :  { %v268_v63 = vld [vmem:[%s2942_s3] sm:$0xff]  ;;  %s2435_s3 = smov 16   ;;  %s1943_s15 = sshll.u32 %s2438_s29, 4  ;;  %s1944_s15 = int_to_ptr.vmem [resolvable:$true] %s1943_s15 }
   0xb   :  { %60 = vperm.xlu0 %2335, %v56_v7   ;;  %2088 = vmatpush3.bf16.msra.mxu0 %v2338_v6  ;;  %s2406_s16 = scalar_lea.vmem %s1944_s15, 16  ;;  %p2411_p1 = scmp.lt.s32.totalorder %s1944_s15, %s1944_s15 }
   0xc   :  { %2107 = vmatprep.subr.mxu0 %v2428_v1  ;;  %p2407_p0 = scmp.ne.s32.totalorder %s1944_s15, %s2406_s16 }
   0xe   :  { %2090 = vmatmul.mubr.msk.bf16.vlgmr.msra.gmra.mxu0 %vm88_vm2, %v2339_v8 }
   0xf   :  { %2111 = vmatprep.mubr.msk.f32.mxu0 %vm2429_vm1, %v2428_v1 }
  0x82   :  { %v66_v9 = vpop.permute.xlu0 %65 }
  0x86   :  { %v61_v10 = vpop.permute.xlu0 %60 }
  0xce   :  { %v130_v11 = vpop.f32.mrf.mxu0 }
  0xcf   :  { %v131_v12 = vadd.f32 %v130_v11, %v61_v10 }
  0xd0   :  { %v2091_v13 = vpop.f32.mrf.mxu0 }
  0xd1   :  { %v137_v14 = vmax.f32 %v131_v12, 0.0 }
  0xd2   :  { %v133_v15 = vpop.f32.mrf.mxu0 }
  0xd3   :  { %v134_v16 = vadd.f32 %v133_v15, %v66_v9  ;;  %141 = vrot.lane.b32.xlu1 %v137_v14, %s2431_s0 }
  0xd4   :  { %v2092_v17 = vpop.f32.mrf.mxu0 }
  0xd5   :  { %v138_v18 = vmax.f32 %v134_v16, 0.0 }
  0xd7   :  { %151 = vrot.lane.b32.xlu0 %v138_v18, %s2432_s1  ;;  %143 = vrot.lane.b32.xlu1 %v138_v18, %s2431_s0 }
  0xdb   :  { %159 = vrot.lane.b32.xlu0 %v138_v18, %s2433_s2  ;;  %149 = vrot.lane.b32.xlu1 %v137_v14, %s2432_s1 }
  0xdf   :  { %171 = vperm.xlu0 %2335, %v168_v19   ;;  %157 = vrot.lane.b32.xlu1 %v137_v14, %s2433_s2  ;;  %v543_v19 = vld [vmem:[%s2945_s6 + $0x78] sm:$0xff] }
 0x145   :  { %v142_v20 = vpop.permute.xlu1 %141 }
 0x146   :  { %v147_v27 = vadd.f32 %v142_v20, %v137_v14  ;;  %v542_v20 = vld [vmem:[%s2945_s6 + $0x70] sm:$0xff] }
 0x149   :  { %v152_v21 = vpop.permute.xlu0 %151  ;;  %v144_v22 = vpop.permute.xlu1 %143 }
 0x14a   :  { %v148_v23 = vadd.f32 %v144_v22, %v138_v18 }
 0x14c   :  { %v156_v24 = vadd.f32 %v152_v21, %v148_v23  ;;  %v541_v23 = vld [vmem:[%s2945_s6 + $0x68] sm:$0xff] }
 0x14d   :  { %v160_v25 = vpop.permute.xlu0 %159  ;;  %v150_v26 = vpop.permute.xlu1 %149 }
 0x14e   :  { %v164_v28 = vadd.f32 %v160_v25, %v156_v24  ;;  %v155_v30 = vadd.f32 %v150_v26, %v147_v27  ;;  %v540_v24 = vld [vmem:[%s2945_s6 + $0x60] sm:$0xff]  ;;  %v539_v25 = vld [vmem:[%s2945_s6 + $0x58] sm:$0xff]  ;;  %v538_v26 = vld [vmem:[%s2945_s6 + $0x50] sm:$0xff] }
 0x14f   :  { %v537_v27 = vld [vmem:[%s2945_s6 + $0x48] sm:$0xff] }
 0x150   :  { %v166_v29 = vmul.f32 0.25, %v164_v28  ;;  %v536_v28 = vld [vmem:[%s2945_s6 + $0x40] sm:$0xff] }
 0x151   :  { %v158_v31 = vpop.permute.xlu1 %157 }
 0x152   :  { %v163_v32 = vadd.f32 %v158_v31, %v155_v30  ;;  %402 = vrot.lane.b32.xlu1 %v166_v29, %s2434_s27  ;;  %2094 = vmatpush3.msra.mxu1 %v166_v29 }
 0x153   :  { %2095 = vmatprep.subr.mxu1 %v2428_v1 }
 0x154   :  { %v165_v33 = vmul.f32 0.25, %v163_v32 }
 0x156   :  { %400 = vrot.lane.b32.xlu0 %v165_v33, %s2434_s27  ;;  %2096 = vmatpush3.msra.mxu1 %v165_v33 }
 0x157   :  { %2098 = vmatmul.mubr.msk.f32.vlgmr.msra.gmra.mxu1 %vm174_vm3, %v167_v34  ;;  %2100 = vmatprep.subr.mxu1 %v2428_v1  ;;  %v534_v34 = vld [vmem:[%s2945_s6 + $0x30] sm:$0xff] }
 0x158   :  { %2101 = vmatpush3.xpose.msk.msra.mxu1 %vm174_vm3, %v166_v29  ;;  %2104 = vmatprep.mubr.msk.f32.mxu1 %vm2429_vm1, %v2428_v1 }
 0x159   :  { %2102 = vmatprep.subr.mxu1 %v2428_v1 }
 0x15a   :  { %v172_v35 = vpop.permute.xlu0 %171 }
 0x15c   :  { %2103 = vmatpush3.xpose.msk.msra.mxu1 %vm174_vm3, %v165_v33  ;;  %v535_v33 = vld [vmem:[%s2945_s6 + $0x38] sm:$0xff] }
 0x15d   :  { %2114 = vmatprep.subr.mxu1 %v2428_v1 }
 0x1c4   :  { %v403_v36 = vpop.permute.xlu1 %402 }
 0x1c5   :  { %2108 = vmatpush3.xpose.msk.msra.mxu0 %vm174_vm3, %v403_v36 }
 0x1c6   :  { %2109 = vmatprep.subr.mxu0 %v2428_v1 }
 0x1c8   :  { %v401_v37 = vpop.permute.xlu0 %400 }
 0x1c9   :  { %2110 = vmatpush3.xpose.msk.msra.mxu0 %vm174_vm3, %v401_v37  ;;  %v533_v37 = vld [vmem:[%s2945_s6 + $0x28] sm:$0xff] }
 0x1ca   :  { %2149 = vmatprep.subr.mxu0 %v2428_v1 }
 0x217   :  { %v244_v38 = vpop.f32.mrf.mxu1 }
 0x218   :  { %v245_v39 = vadd.f32 %v244_v38, %v172_v35  ;;  %v532_v38 = vld [vmem:[%s2945_s6 + $0x20] sm:$0xff] }
 0x219   :  { %v2099_v40 = vpop.f32.mrf.mxu1 }
 0x21a   :  { %v249_v41 = vsel %vm248_vm4, %v245_v39, -inf  ;;  %v531_v40 = vld [vmem:[%s2945_s6 + $0x18] sm:$0xff] }
 0x21b   :  { %v250_v42 = vrot.slane %v249_v41, 4 }
 0x21d   :  { %v251_v43 = vmax.f32 %v249_v41, %v250_v42  ;;  %v530_v41 = vld [vmem:[%s2945_s6 + $0x10] sm:$0xff]  ;;  %v529_v42 = vld [vmem:[%s2945_s6 + $0x8] sm:$0xff] }
 0x21f   :  { %v252_v44 = vrot.slane %v251_v43, 2 }
 0x221   :  { %v253_v45 = vmax.f32 %v251_v43, %v252_v44  ;;  %v528_v43 = vld [vmem:[%s2945_s6] sm:$0xff] }
 0x223   :  { %v254_v46 = vrot.slane %v253_v45, 1 }
 0x225   :  { %v255_v47 = vmax.f32 %v253_v45, %v254_v46 }
 0x227   :  { %v256_v48 = vsub.f32 %v245_v39, %v255_v47 }
 0x229   :  { %v257_v49 = vmul.f32 1.442695, %v256_v48 }
 0x22b   :  { %2340 = vpow2.f32 %v257_v49 }
 0x238   :  { %v2341_v50 = vpop.eup %2340 }
 0x239   :  { %v259_v51 = vsel %vm248_vm4, %v2341_v50, 0.0 }
 0x23a   :  { %v260_v52 = vrot.slane %v259_v51, 4 }
 0x23c   :  { %v261_v53 = vadd.f32 %v260_v52, %v259_v51 }
 0x23e   :  { %v262_v54 = vrot.slane %v261_v53, 2 }
 0x240   :  { %v263_v55 = vadd.f32 %v262_v54, %v261_v53 }
 0x242   :  { %v264_v56 = vrot.slane %v263_v55, 1 }
 0x244   :  { %v265_v57 = vadd.f32 %v264_v56, %v263_v55  ;;  %v636_v56 = vld [vmem:[%s2948_s9 + $0x8] sm:$0xff] }
 0x246   :  { %2342 = vrcp.f32 %v265_v57  ;;  %v635_v57 = vld [vmem:[%s2948_s9] sm:$0xff] }
 0x253   :  { %v2343_v58 = vpop.eup %2342 }
 0x254   :  { %v267_v59 = vmul.f32 %v2343_v58, %v2341_v50  ;;  %v2699_v58 = vld [vmem:[%s2947_s8] sm:$0xff]  ;;  %s2410_s8 = scalar_lea.vmem %s1944_s15, 32 }
 0x255   :  { %p2412_p2 = scmp.lt.s32.totalorder %s2410_s8, %s2406_s16 }
 0x256   :  { %398 = vrot.lane.b32.xlu1 %v267_v59, %s2434_s27  ;;  %2105 = vmatmul.mubr.msk.f32.vlgmr.msra.gmra.mxu1 %vm174_vm3, %v267_v59  ;;  %v348_v60 = vsel %vm174_vm3, %v267_v59, 0.0  ;;  %v2705_v59 = vld [vmem:[%s2949_s10 + $0x18] sm:$0xff] }
 0x257   :  { %349 = vadd.xlane.f32.xlu0 %v348_v60  ;;  %2146 = vmatprep.mubr.msk.f32.mxu1 %vm2429_vm1, %v2428_v1  ;;  %v2717_v60 = vld [vmem:[%s2949_s10 + $0x10] sm:$0xff]  ;;  %p2413_p3 = por %p2412_p2, %p2411_p1 }
 0x258   :  { %2115 = vmatpush3.msra.mxu1 %v543_v19 }
 0x259   :  { %2116 = vmatprep.subr.mxu1 %v2428_v1  ;;  %p2414_p4 = pnand %p2413_p3, %p2407_p0 }
 0x25a   :  { %2117 = vmatpush3.msra.mxu1 %v542_v20 }
 0x25b   :  { %2118 = vmatprep.subr.mxu1 %v2428_v1 }
 0x25c   :  { %2119 = vmatpush3.msra.mxu1 %v541_v23 }
 0x25d   :  { %2120 = vmatprep.subr.mxu1 %v2428_v1 }
 0x25e   :  { %2121 = vmatpush3.msra.mxu1 %v540_v24  ;;  %v2808_v24 = vld [vmem:[%s2952_s13] sm:$0x1] }
 0x25f   :  { %2122 = vmatprep.subr.mxu1 %v2428_v1 }
 0x260   :  { %2123 = vmatpush3.msra.mxu1 %v539_v25 }
 0x261   :  { %2124 = vmatprep.subr.mxu1 %v2428_v1 }
 0x262   :  { %2125 = vmatpush3.msra.mxu1 %v538_v26 }
 0x263   :  { %2126 = vmatprep.subr.mxu1 %v2428_v1 }
 0x264   :  { %2127 = vmatpush3.msra.mxu1 %v537_v27 }
 0x265   :  { %2128 = vmatprep.subr.mxu1 %v2428_v1 }
 0x266   :  { %2129 = vmatpush3.msra.mxu1 %v536_v28 }
 0x267   :  { %2130 = vmatprep.subr.mxu1 %v2428_v1 }
 0x268   :  { %2131 = vmatpush3.msra.mxu1 %v535_v33 }
 0x269   :  { %2132 = vmatprep.subr.mxu1 %v2428_v1 }
 0x26a   :  { %2133 = vmatpush3.msra.mxu1 %v534_v34 }
 0x26b   :  { %2134 = vmatprep.subr.mxu1 %v2428_v1 }
 0x26c   :  { %2135 = vmatpush3.msra.mxu1 %v533_v37 }
 0x26d   :  { %2136 = vmatprep.subr.mxu1 %v2428_v1 }
 0x26e   :  { %2137 = vmatpush3.msra.mxu1 %v532_v38 }
 0x26f   :  { %2138 = vmatprep.subr.mxu1 %v2428_v1 }
 0x270   :  { %2139 = vmatpush3.msra.mxu1 %v531_v40  ;;  %v874_v40 = vrot.slane %v2699_v58, 1 }
 0x271   :  { %2140 = vmatprep.subr.mxu1 %v2428_v1 }
 0x272   :  { %2141 = vmatpush3.msra.mxu1 %v530_v41 }
 0x273   :  { %2142 = vmatprep.subr.mxu1 %v2428_v1 }
 0x274   :  { %2143 = vmatpush3.msra.mxu1 %v529_v42 }
 0x275   :  { %2144 = vmatprep.subr.mxu1 %v2428_v1 }
 0x276   :  { %2145 = vmatpush3.msra.mxu1 %v528_v43 }
 0x277   :  { %2189 = vmatprep.subr.mxu1 %v2428_v1 }
 0x2c8   :  { %v399_v61 = vpop.permute.xlu1 %398 }
 0x2c9   :  { %2112 = vmatmul.mubr.msk.f32.vlgmr.msra.gmra.mxu0 %vm174_vm3, %v399_v61  ;;  %v481_v62 = vsel %vm174_vm3, %v399_v61, 0.0  ;;  %v2724_v61 = vld [vmem:[%s2949_s10 + $0x8] sm:$0xff] }
 0x2ca   :  { %482 = vadd.xlane.f32.xlu1 %v481_v62  ;;  %2153 = vmatprep.mubr.msk.f32.mxu0 %vm2429_vm1, %v2428_v1  ;;  %v2731_v62 = vld [vmem:[%s2949_s10] sm:$0xff] }
 0x2cb   :  { %2150 = vmatpush3.msra.mxu0 %v636_v56 }
 0x2cc   :  { %2151 = vmatprep.subr.mxu0 %v2428_v1 }
 0x2cd   :  { %2152 = vmatpush3.msra.mxu0 %v635_v57 }
 0x2ce   :  { %2154 = vmatmul.mubr.msk.f32.vlgmr.msra.gmra.mxu0 %vm174_vm3, %v2699_v58  ;;  %2156 = vmatprep.subr.mxu0 %v2428_v1 }
 0x2cf   :  { %2157 = vmatpush3.msra.mxu0 %v2705_v59  ;;  %2164 = vmatprep.mubr.msk.f32.mxu0 %vm2429_vm1, %v2428_v1 }
 0x2d0   :  { %2158 = vmatprep.subr.mxu0 %v2428_v1 }
 0x2d1   :  { %2159 = vmatpush3.msra.mxu0 %v2717_v60 }
 0x2d2   :  { %2160 = vmatprep.subr.mxu0 %v2428_v1 }
 0x2d3   :  { %2161 = vmatpush3.msra.mxu0 %v2724_v61 }
 0x2d4   :  { %2162 = vmatprep.subr.mxu0 %v2428_v1 }
 0x2d5   :  { %2163 = vmatpush3.msra.mxu0 %v2731_v62 }
 0x2d6   :  { %2167 = vmatprep.subr.mxu0 %v2428_v1 }
 0x2e0   :  { %v350_v0 = vpop.xlane.xlu0 %349 }
 0x2e1   :  { %v351_v2 = vmul.f32 %v350_v0, %v268_v63 }
 0x316   :  { %v344_v3 = vpop.f32.mrf.mxu1 }
 0x317   :  { %v352_v4 = vsub.f32 %v344_v3, %v351_v2 }
 0x318   :  { %v2106_v5 = vpop.f32.mrf.mxu1 }
 0x319   :  { %v353_v6 = vmul.f32 %v352_v4, %v352_v4 }
 0x31b   :  { %v354_v7 = vsel %vm174_vm3, %v353_v6, 0.0 }
 0x31c   :  { %355 = vadd.xlane.f32.xlu0 %v354_v7 }
 0x353   :  { %v483_v8 = vpop.xlane.xlu1 %482 }
 0x354   :  { %v484_v9 = vmul.f32 %v483_v8, %v268_v63 }
 0x389   :  { %v476_v10 = vpop.f32.mrf.mxu0 }
 0x38a   :  { %v485_v11 = vsub.f32 %v476_v10, %v484_v9  ;;  %v2744_v10 = vld [vmem:[%s2951_s12 + $0x18] sm:$0xff] }
 0x38b   :  { %v2113_v12 = vpop.f32.mrf.mxu0 }
 0x38c   :  { %v486_v13 = vmul.f32 %v485_v11, %v485_v11  ;;  %v2757_v12 = vld [vmem:[%s2951_s12 + $0x8] sm:$0xff] }
 0x38e   :  { %v487_v14 = vsel %vm174_vm3, %v486_v13, 0.0  ;;  %v713_v8 = vpop.f32.mrf.mxu0  ;;  %v2766_v13 = vld [vmem:[%s2951_s12] sm:$0xff] }
 0x38f   :  { %488 = vadd.xlane.f32.xlu0 %v487_v14  ;;  %v1964_v14 = vld [vmem:[%s2950_s11] ss:$0 sm:$0xff] }
 0x390   :  { %v2155_v9 = vpop.f32.mrf.mxu0 }
 0x3a5   :  { %v356_v15 = vpop.xlane.xlu0 %355 }
 0x3a6   :  { %v357_v16 = vmax.f32 %v356_v15, 1e-24  ;;  %v2780_v15 = vadd.f32 %v1964_v14, %v713_v8 }
 0x3a8   :  { %2344 = vrsqrt.f32 %v357_v16 }
 0x3b5   :  { %v2345_v17 = vpop.eup %2344 }
 0x3b6   :  { %v2587_v18 = vmul.f32 %v2345_v17, %v352_v4  ;;  %v1963_v4 = vld [vmem:[%s2946_s7] ss:$0 sm:$0xff] }
 0x3b8   :  { %363 = vrot.lane.b32.xlu1 %v2587_v18, %s2435_s3  ;;  %373 = vrot.lane.b32.xlu0 %v2587_v18, %s2436_s30  ;;  %361 = vst.msk [vmem:[#allocation2] sm:$0x1] %vm360_vm5, %v2587_v18 }
 0x3bc   :  { %368 = vrot.lane.b32.xlu1 %v2587_v18, %s2433_s2  ;;  %378 = vrot.lane.b32.xlu0 %v2587_v18, %s2432_s1 }
 0x3c0   :  { %383 = vrot.lane.b32.xlu0 %v2587_v18, %s2437_s19 }
 0x418   :  { %v489_v21 = vpop.xlane.xlu0 %488 }
 0x419   :  { %v490_v22 = vmax.f32 %v489_v21, 1e-24 }
 0x41b   :  { %2346 = vrsqrt.f32 %v490_v22 }
 0x428   :  { %v2347_v29 = vpop.eup %2346 }
 0x429   :  { %v492_v30 = vmul.f32 %v2347_v29, %v485_v11  ;;  %v2749_v11 = vld [vmem:[%s2951_s12 + $0x10] sm:$0xff] }
 0x42a   :  { %v364_v31 = vpop.permute.xlu1 %363  ;;  %v374_v32 = vpop.permute.xlu0 %373 }
 0x42b   :  { %367 = vst.msk [vmem:[#allocation2 - $0x1] sm:$0x2] %vm366_vm6, %v364_v31  ;;  %499 = vrot.lane.b32.xlu1 %v492_v30, %s2433_s2  ;;  %495 = vrot.lane.b32.xlu0 %v492_v30, %s2435_s3 }
 0x42c   :  { %493 = vst.msk [vmem:[#allocation2 + $0x1] sm:$0x1] %vm360_vm5, %v492_v30 }
 0x42e   :  { %v369_v35 = vpop.permute.xlu1 %368  ;;  %v379_v36 = vpop.permute.xlu0 %378 }
 0x42f   :  { %372 = vst.msk [vmem:[#allocation2 - $0x2] sm:$0x4] %vm371_vm7, %v369_v35  ;;  %503 = vrot.lane.b32.xlu1 %v492_v30, %s2436_s30  ;;  %388 = vrot.lane.b32.xlu0 %v2587_v18, %s2431_s0 }
 0x430   :  { %377 = vst.msk [vmem:[#allocation2 - $0x3] sm:$0x8] %vm376_vm8, %v374_v32 }
 0x431   :  { %382 = vst.msk [vmem:[#allocation2 - $0x4] sm:$0x10] %vm381_vm9, %v379_v36 }
 0x432   :  { %v384_v39 = vpop.permute.xlu0 %383 }
 0x433   :  { %387 = vst.msk [vmem:[#allocation2 - $0x5] sm:$0x20] %vm386_vm10, %v384_v39  ;;  %507 = vrot.lane.b32.xlu1 %v492_v30, %s2432_s1  ;;  %393 = vrot.lane.b32.xlu0 %v2587_v18, %s2434_s27 }
 0x437   :  { %511 = vrot.lane.b32.xlu1 %v492_v30, %s2437_s19 }
 0x43b   :  { %515 = vrot.lane.b32.xlu1 %v492_v30, %s2431_s0 }
 0x43f   :  { %519 = vrot.lane.b32.xlu1 %v492_v30, %s2434_s27 }
 0x49d   :  { %v500_v44 = vpop.permute.xlu1 %499  ;;  %v496_v45 = vpop.permute.xlu0 %495 }
 0x49e   :  { %498 = vst.msk [vmem:[#allocation2] sm:$0x2] %vm366_vm6, %v496_v45 }
 0x49f   :  { %502 = vst.msk [vmem:[#allocation2 - $0x1] sm:$0x4] %vm371_vm7, %v500_v44 }
 0x4a1   :  { %v504_v46 = vpop.permute.xlu1 %503  ;;  %v389_v47 = vpop.permute.xlu0 %388 }
 0x4a2   :  { %506 = vst.msk [vmem:[#allocation2 - $0x2] sm:$0x8] %vm376_vm8, %v504_v46 }
 0x4a3   :  { %392 = vst.msk [vmem:[#allocation2 - $0x6] sm:$0x40] %vm391_vm11, %v389_v47 }
 0x4a5   :  { %v508_v48 = vpop.permute.xlu1 %507  ;;  %v394_v49 = vpop.permute.xlu0 %393 }
 0x4a6   :  { %510 = vst.msk [vmem:[#allocation2 - $0x3] sm:$0x10] %vm381_vm9, %v508_v48 }
 0x4a7   :  { %397 = vst.msk [vmem:[#allocation2 - $0x7] sm:$0x80] %vm396_vm12, %v394_v49 }
 0x4a9   :  { %v512_v50 = vpop.permute.xlu1 %511 }
 0x4aa   :  { %514 = vst.msk [vmem:[#allocation2 - $0x4] sm:$0x20] %vm386_vm10, %v512_v50 }
 0x4ad   :  { %v516_v51 = vpop.permute.xlu1 %515 }
 0x4ae   :  { %518 = vst.msk [vmem:[#allocation2 - $0x5] sm:$0x40] %vm391_vm11, %v516_v51 }
 0x4b1   :  { %v520_v52 = vpop.permute.xlu1 %519 }
 0x4b2   :  { %522 = vst.msk [vmem:[#allocation2 - $0x6] sm:$0x80] %vm396_vm12, %v520_v52 }
 0x4b9   :  { %v523_v53 = vld [vmem:[#allocation2] sm:$0x3] }
 0x4ba   :  { %2147 = vmatmul.mubr.f32.vlgmr.msra.gmra.mxu1 %v523_v53  ;;  %v524_v54 = vmul.f32 %v523_v53, %v523_v53 }
 0x4bb   :  { %2197 = vmatprep.mubr.msk.f32.mxu1 %vm2429_vm1, %v2428_v1  ;;  %2190 = vmatpush3.msra.mxu1 %v2744_v10 }
 0x4bc   :  { %v525_v55 = vsel %vm92_vm0, %v524_v54, 0.0  ;;  %2191 = vmatprep.subr.mxu1 %v2428_v1 }
 0x4bd   :  { %526 = vadd.xlane.f32.xlu0 %v525_v55  ;;  %2192 = vmatpush3.msra.mxu1 %v2749_v11 }
 0x4be   :  { %2193 = vmatprep.subr.mxu1 %v2428_v1 }
 0x4bf   :  { %2194 = vmatpush3.msra.mxu1 %v2757_v12 }
 0x4c0   :  { %2195 = vmatprep.subr.mxu1 %v2428_v1 }
 0x4c1   :  { %2196 = vmatpush3.msra.mxu1 %v2766_v13 }
 0x4c2   :  { %2211 = vmatprep.subr.mxu1 %v2428_v1 }
 0x546   :  { %v527_v63 = vpop.xlane.xlu0 %526 }
 0x547   :  { %v614_v0 = vmax.f32 %v527_v63, 1e-24 }
 0x549   :  { %2348 = vrsqrt.f32 %v614_v0 }
 0x556   :  { %v2349_v2 = vpop.eup %2348 }
 0x57a   :  { %v610_v3 = vpop.f32.mrf.mxu1 }
 0x57b   :  { %v616_v5 = vmul.f32 %v2349_v2, %v610_v3 }
 0x57c   :  { %v2148_v6 = vpop.f32.mrf.mxu1 }
 0x57d   :  { %v624_v7 = vadd.f32 %v1963_v4, %v616_v5 }
 0x57f   :  { %2165 = vmatmul.mubr.msk.f32.vlgmr.msra.gmra.mxu0 %vm248_vm4, %v624_v7 }
 0x580   :  { %2175 = vmatprep.mubr.msk.f32.mxu0 %vm2429_vm1, %v2428_v1  ;;  %2168 = vmatpush3.msra.mxu0 %v2744_v10 }
 0x581   :  { %2169 = vmatprep.subr.mxu0 %v2428_v1 }
 0x582   :  { %2170 = vmatpush3.msra.mxu0 %v2749_v11 }
 0x583   :  { %2171 = vmatprep.subr.mxu0 %v2428_v1 }
 0x584   :  { %2172 = vmatpush3.msra.mxu0 %v2757_v12 }
 0x585   :  { %2173 = vmatprep.subr.mxu0 %v2428_v1 }
 0x586   :  { %2174 = vmatpush3.msra.mxu0 %v2766_v13 }
 0x587   :  { %2178 = vmatprep.subr.mxu0 %v2428_v1 }
 0x63f   :  { %v786_v16 = vpop.f32.mrf.mxu0 }
 0x640   :  { %v790_v17 = vadd.f32 %v786_v16, %v2780_v15  ;;  %v1048_v16 = vrot.slane %v2699_v58, 2 }
 0x641   :  { %v2166_v18 = vpop.f32.mrf.mxu0 }
 0x642   :  { %v791_v19 = vsub.f32 0.0, %v790_v17 }
 0x644   :  { %v792_v20 = vmul.f32 1.442695, %v791_v19 }
 0x646   :  { %2350 = vpow2.f32 %v792_v20 }
 0x653   :  { %v2351_v21 = vpop.eup %2350 }
 0x654   :  { %v794_v22 = vadd.f32 1.0, %v2351_v21 }
 0x656   :  { %2352 = vrcp.f32 %v794_v22 }
 0x663   :  { %v2353_v23 = vpop.eup %2352 }
 0x664   :  { %2176 = vmatmul.mubr.msk.f32.vlgmr.msra.gmra.mxu0 %vm248_vm4, %v2353_v23 }
 0x665   :  { %2179 = vmatpush3.msra.mxu0 %v2705_v59  ;;  %2186 = vmatprep.mubr.msk.f32.mxu0 %vm2429_vm1, %v2428_v1 }
 0x666   :  { %2180 = vmatprep.subr.mxu0 %v2428_v1 }
 0x667   :  { %2181 = vmatpush3.msra.mxu0 %v2717_v60 }
 0x668   :  { %2182 = vmatprep.subr.mxu0 %v2428_v1 }
 0x669   :  { %2183 = vmatpush3.msra.mxu0 %v2724_v61 }
 0x66a   :  { %2184 = vmatprep.subr.mxu0 %v2428_v1 }
 0x66b   :  { %2185 = vmatpush3.msra.mxu0 %v2731_v62 }
 0x66c   :  { %2187 = vmatmul.mubr.msk.f32.vlgmr.msra.gmra.mxu0 %vm248_vm4, %v2353_v23  ;;  %2200 = vmatprep.subr.mxu0 %v2428_v1 }
 0x66d   :  { %2201 = vmatpush3.msra.mxu0 %v2705_v59  ;;  %2208 = vmatprep.mubr.msk.f32.mxu0 %vm2429_vm1, %v2428_v1 }
 0x66e   :  { %2202 = vmatprep.subr.mxu0 %v2428_v1 }
 0x66f   :  { %2203 = vmatpush3.msra.mxu0 %v2717_v60 }
 0x670   :  { %2204 = vmatprep.subr.mxu0 %v2428_v1 }
 0x671   :  { %2205 = vmatpush3.msra.mxu0 %v2724_v61 }
 0x672   :  { %2206 = vmatprep.subr.mxu0 %v2428_v1 }
 0x673   :  { %2207 = vmatpush3.msra.mxu0 %v2731_v62 }
 0x674   :  { %2222 = vmatprep.subr.mxu0 %v2428_v1 }
 0x724   :  { %v865_v25 = vpop.f32.mrf.mxu0 }
 0x725   :  { %v866_v26 = vadd.f32 %v865_v25, %v2808_v24 }
 0x726   :  { %v2177_v27 = vpop.f32.mrf.mxu0 }
 0x727   :  { %v869_v28 = vsub.f32 0.0, %v866_v26 }
 0x729   :  { %v870_v29 = vmul.f32 1.442695, %v869_v28 }
 0x72b   :  { %2354 = vpow2.f32 %v870_v29 }
 0x72c   :  { %v956_v30 = vpop.f32.mrf.mxu0 }
 0x72d   :  { %v961_v31 = vrot.slane %v956_v30, 7 }
 0x72e   :  { %v2188_v32 = vpop.f32.mrf.mxu0 }
 0x72f   :  { %v963_v33 = vadd.f32 %v961_v31, %v2780_v15 }
 0x731   :  { %v964_v34 = vsub.f32 0.0, %v963_v33 }
 0x733   :  { %v965_v35 = vmul.f32 1.442695, %v964_v34 }
 0x735   :  { %2356 = vpow2.f32 %v965_v35 }
 0x738   :  { %v2355_v36 = vpop.eup %2354 }
 0x739   :  { %v872_v37 = vadd.f32 1.0, %v2355_v36 }
 0x73b   :  { %2358 = vrcp.f32 %v872_v37 }
 0x742   :  { %v2357_v38 = vpop.eup %2356 }
 0x743   :  { %v967_v39 = vadd.f32 1.0, %v2357_v38 }
 0x745   :  { %2360 = vrcp.f32 %v967_v39 }
 0x748   :  { %v2359_v41 = vpop.eup %2358 }
 0x749   :  { %v876_v42 = vsub.f32 %v2359_v41, %v874_v40 }
 0x74b   :  { %v877_v43 = vmul.f32 %v876_v42, %v876_v42 }
 0x74d   :  { %v878_v44 = vsel %vm360_vm5, %v877_v43, 0.0 }
 0x74e   :  { %879 = vadd.xlane.f32.xlu1 %v878_v44 }
 0x752   :  { %v2361_v45 = vpop.eup %2360 }
 0x753   :  { %v970_v46 = vrot.slane %v2361_v45, 1 }
 0x755   :  { %2198 = vmatmul.mubr.msk.f32.vlgmr.msra.gmra.mxu1 %vm248_vm4, %v970_v46  ;;  %2209 = vmatmul.mubr.msk.f32.vlgmr.msra.gmra.mxu0 %vm248_vm4, %v970_v46  ;;  %v1222_v46 = vrot.slane %v2699_v58, 3 }
 0x756   :  { %2212 = vmatpush3.msra.mxu1 %v2744_v10  ;;  %2223 = vmatpush3.msra.mxu0 %v2705_v59 }
 0x757   :  { %2213 = vmatprep.subr.mxu1 %v2428_v1  ;;  %2224 = vmatprep.subr.mxu0 %v2428_v1 }
 0x758   :  { %2214 = vmatpush3.msra.mxu1 %v2749_v11  ;;  %2225 = vmatpush3.msra.mxu0 %v2717_v60 }
 0x759   :  { %2215 = vmatprep.subr.mxu1 %v2428_v1  ;;  %2226 = vmatprep.subr.mxu0 %v2428_v1 }
 0x75a   :  { %2216 = vmatpush3.msra.mxu1 %v2757_v12  ;;  %2227 = vmatpush3.msra.mxu0 %v2724_v61 }
 0x75b   :  { %2217 = vmatprep.subr.mxu1 %v2428_v1  ;;  %2228 = vmatprep.subr.mxu0 %v2428_v1 }
 0x75c   :  { %2218 = vmatpush3.msra.mxu1 %v2766_v13  ;;  %2219 = vmatprep.mubr.msk.f32.mxu1 %vm2429_vm1, %v2428_v1 }
 0x75d   :  { %2229 = vmatpush3.msra.mxu0 %v2731_v62  ;;  %2230 = vmatprep.mubr.msk.f32.mxu0 %vm2429_vm1, %v2428_v1 }
 0x75e   :  { %2233 = vmatprep.subr.mxu1 %v2428_v1  ;;  %2244 = vmatprep.subr.mxu0 %v2428_v1 }
 0x7d7   :  { %v880_v47 = vpop.xlane.xlu1 %879 }
 0x7d8   :  { %v881_v48 = vrot.slane %v880_v47, 4 }
 0x7da   :  { %v882_v49 = vadd.f32 %v881_v48, %v880_v47 }
 0x7dc   :  { %v883_v50 = vrot.slane %v882_v49, 2 }
 0x7de   :  { %v884_v51 = vadd.f32 %v883_v50, %v882_v49 }
 0x7e0   :  { %v885_v52 = vrot.slane %v884_v51, 1 }
 0x7e2   :  { %v886_v53 = vadd.f32 %v885_v52, %v884_v51 }
 0x7e4   :  { %2310 = vpush %v886_v53 }
 0x815   :  { %v1039_v54 = vpop.f32.mrf.mxu1  ;;  %v1130_v55 = vpop.f32.mrf.mxu0  ;;  %s2311_s13 = spop %2310 }
 0x816   :  { %v1040_v56 = vadd.f32 %v1039_v54, %v2808_v24  ;;  %v1135_v57 = vrot.slane %v1130_v55, 6 }
 0x817   :  { %v2199_v63 = vpop.f32.mrf.mxu1  ;;  %v2210_v0 = vpop.f32.mrf.mxu0 }
 0x818   :  { %v1043_v2 = vsub.f32 0.0, %v1040_v56  ;;  %v1137_v3 = vadd.f32 %v1135_v57, %v2780_v15 }
 0x81a   :  { %v1044_v4 = vmul.f32 1.442695, %v1043_v2  ;;  %v1138_v5 = vsub.f32 0.0, %v1137_v3 }
 0x81c   :  { %2362 = vpow2.f32 %v1044_v4  ;;  %v1139_v6 = vmul.f32 1.442695, %v1138_v5 }
 0x81e   :  { %2364 = vpow2.f32 %v1139_v6 }
 0x829   :  { %v2363_v7 = vpop.eup %2362 }
 0x82a   :  { %v1046_v8 = vadd.f32 1.0, %v2363_v7 }
 0x82b   :  { %v2365_v9 = vpop.eup %2364 }
 0x82c   :  { %2366 = vrcp.f32 %v1046_v8  ;;  %v1141_v14 = vadd.f32 1.0, %v2365_v9 }
 0x82e   :  { %2368 = vrcp.f32 %v1141_v14 }
 0x839   :  { %v2367_v17 = vpop.eup %2366 }
 0x83a   :  { %v1050_v18 = vsub.f32 %v2367_v17, %v1048_v16 }
 0x83b   :  { %v2369_v19 = vpop.eup %2368 }
 0x83c   :  { %v1144_v20 = vrot.slane %v2369_v19, 2  ;;  %v1051_v21 = vmul.f32 %v1050_v18, %v1050_v18 }
 0x83e   :  { %2220 = vmatmul.mubr.msk.f32.vlgmr.msra.gmra.mxu1 %vm248_vm4, %v1144_v20  ;;  %2231 = vmatmul.mubr.msk.f32.vlgmr.msra.gmra.mxu0 %vm248_vm4, %v1144_v20  ;;  %v1052_v22 = vsel %vm360_vm5, %v1051_v21, 0.0 }
 0x83f   :  { %1053 = vadd.xlane.f32.xlu0 %v1052_v22  ;;  %2234 = vmatpush3.msra.mxu1 %v2744_v10  ;;  %v1396_v22 = vrot.slane %v2699_v58, 4 }
 0x840   :  { %2245 = vmatpush3.msra.mxu0 %v2705_v59  ;;  %2235 = vmatprep.subr.mxu1 %v2428_v1 }
 0x841   :  { %2246 = vmatprep.subr.mxu0 %v2428_v1  ;;  %2236 = vmatpush3.msra.mxu1 %v2749_v11 }
 0x842   :  { %2247 = vmatpush3.msra.mxu0 %v2717_v60  ;;  %2237 = vmatprep.subr.mxu1 %v2428_v1 }
 0x843   :  { %2248 = vmatprep.subr.mxu0 %v2428_v1  ;;  %2238 = vmatpush3.msra.mxu1 %v2757_v12 }
 0x844   :  { %2249 = vmatpush3.msra.mxu0 %v2724_v61  ;;  %2239 = vmatprep.subr.mxu1 %v2428_v1 }
 0x845   :  { %2250 = vmatprep.subr.mxu0 %v2428_v1  ;;  %2240 = vmatpush3.msra.mxu1 %v2766_v13 }
 0x846   :  { %2241 = vmatprep.mubr.msk.f32.mxu1 %vm2429_vm1, %v2428_v1  ;;  %2251 = vmatpush3.msra.mxu0 %v2731_v62 }
 0x847   :  { %2252 = vmatprep.mubr.msk.f32.mxu0 %vm2429_vm1, %v2428_v1  ;;  %2255 = vmatprep.subr.mxu1 %v2428_v1 }
 0x848   :  { %2266 = vmatprep.subr.mxu0 %v2428_v1 }
 0x8c8   :  { %v1054_v23 = vpop.xlane.xlu0 %1053 }
 0x8c9   :  { %v1055_v25 = vrot.slane %v1054_v23, 4 }
 0x8cb   :  { %v1056_v26 = vadd.f32 %v1055_v25, %v1054_v23 }
 0x8cd   :  { %v1057_v27 = vrot.slane %v1056_v26, 2 }
 0x8cf   :  { %v1058_v28 = vadd.f32 %v1057_v27, %v1056_v26 }
 0x8d1   :  { %v1059_v29 = vrot.slane %v1058_v28, 1 }
 0x8d3   :  { %v1060_v30 = vadd.f32 %v1059_v29, %v1058_v28 }
 0x8d5   :  { %2312 = vpush %v1060_v30 }
 0x8fe   :  { %v1213_v31 = vpop.f32.mrf.mxu1  ;;  %v1304_v32 = vpop.f32.mrf.mxu0 }
 0x8ff   :  { %v1214_v33 = vadd.f32 %v1213_v31, %v2808_v24  ;;  %v1309_v34 = vrot.slane %v1304_v32, 5 }
 0x900   :  { %v2221_v35 = vpop.f32.mrf.mxu1  ;;  %v2232_v36 = vpop.f32.mrf.mxu0 }
 0x901   :  { %v1217_v37 = vsub.f32 0.0, %v1214_v33  ;;  %v1311_v38 = vadd.f32 %v1309_v34, %v2780_v15 }
 0x903   :  { %v1218_v39 = vmul.f32 1.442695, %v1217_v37  ;;  %v1312_v40 = vsub.f32 0.0, %v1311_v38 }
 0x905   :  { %2370 = vpow2.f32 %v1218_v39  ;;  %v1313_v41 = vmul.f32 1.442695, %v1312_v40 }
 0x906   :  { %s2313_s28 = spop %2312 }
 0x907   :  { %2372 = vpow2.f32 %v1313_v41 }
 0x912   :  { %v2371_v42 = vpop.eup %2370 }
 0x913   :  { %v1220_v43 = vadd.f32 1.0, %v2371_v42 }
 0x914   :  { %v2373_v44 = vpop.eup %2372 }
 0x915   :  { %2374 = vrcp.f32 %v1220_v43  ;;  %v1315_v45 = vadd.f32 1.0, %v2373_v44 }
 0x917   :  { %2376 = vrcp.f32 %v1315_v45 }
 0x922   :  { %v2375_v47 = vpop.eup %2374 }
 0x923   :  { %v1224_v48 = vsub.f32 %v2375_v47, %v1222_v46 }
 0x924   :  { %v2377_v49 = vpop.eup %2376 }
 0x925   :  { %v1318_v50 = vrot.slane %v2377_v49, 3  ;;  %v1225_v51 = vmul.f32 %v1224_v48, %v1224_v48  ;;  %v1570_v48 = vrot.slane %v2699_v58, 5 }
 0x927   :  { %2242 = vmatmul.mubr.msk.f32.vlgmr.msra.gmra.mxu1 %vm248_vm4, %v1318_v50  ;;  %2253 = vmatmul.mubr.msk.f32.vlgmr.msra.gmra.mxu0 %vm248_vm4, %v1318_v50  ;;  %v1226_v52 = vsel %vm360_vm5, %v1225_v51, 0.0 }
 0x928   :  { %1227 = vadd.xlane.f32.xlu0 %v1226_v52  ;;  %2256 = vmatpush3.msra.mxu1 %v2744_v10 }
 0x929   :  { %2267 = vmatpush3.msra.mxu0 %v2705_v59  ;;  %2257 = vmatprep.subr.mxu1 %v2428_v1 }
 0x92a   :  { %2268 = vmatprep.subr.mxu0 %v2428_v1  ;;  %2258 = vmatpush3.msra.mxu1 %v2749_v11 }
 0x92b   :  { %2269 = vmatpush3.msra.mxu0 %v2717_v60  ;;  %2259 = vmatprep.subr.mxu1 %v2428_v1 }
 0x92c   :  { %2270 = vmatprep.subr.mxu0 %v2428_v1  ;;  %2260 = vmatpush3.msra.mxu1 %v2757_v12 }
 0x92d   :  { %2271 = vmatpush3.msra.mxu0 %v2724_v61  ;;  %2261 = vmatprep.subr.mxu1 %v2428_v1 }
 0x92e   :  { %2272 = vmatprep.subr.mxu0 %v2428_v1  ;;  %2262 = vmatpush3.msra.mxu1 %v2766_v13 }
 0x92f   :  { %2263 = vmatprep.mubr.msk.f32.mxu1 %vm2429_vm1, %v2428_v1  ;;  %2273 = vmatpush3.msra.mxu0 %v2731_v62 }
 0x930   :  { %2274 = vmatprep.mubr.msk.f32.mxu0 %vm2429_vm1, %v2428_v1  ;;  %2277 = vmatprep.subr.mxu1 %v2428_v1 }
 0x931   :  { %2288 = vmatprep.subr.mxu0 %v2428_v1 }
 0x9b1   :  { %v1228_v53 = vpop.xlane.xlu0 %1227 }
 0x9b2   :  { %v1229_v54 = vrot.slane %v1228_v53, 4 }
 0x9b4   :  { %v1230_v55 = vadd.f32 %v1229_v54, %v1228_v53 }
 0x9b6   :  { %v1231_v56 = vrot.slane %v1230_v55, 2 }
 0x9b8   :  { %v1232_v57 = vadd.f32 %v1231_v56, %v1230_v55 }
 0x9ba   :  { %v1233_v63 = vrot.slane %v1232_v57, 1 }
 0x9bc   :  { %v1234_v0 = vadd.f32 %v1233_v63, %v1232_v57 }
 0x9be   :  { %2314 = vpush %v1234_v0 }
 0x9e7   :  { %v1387_v2 = vpop.f32.mrf.mxu1  ;;  %v1478_v3 = vpop.f32.mrf.mxu0 }
 0x9e8   :  { %v1388_v4 = vadd.f32 %v1387_v2, %v2808_v24  ;;  %v1483_v5 = vrot.slane %v1478_v3, 4 }
 0x9e9   :  { %v2243_v6 = vpop.f32.mrf.mxu1  ;;  %v2254_v7 = vpop.f32.mrf.mxu0 }
 0x9ea   :  { %v1391_v8 = vsub.f32 0.0, %v1388_v4  ;;  %v1485_v9 = vadd.f32 %v1483_v5, %v2780_v15 }
 0x9ec   :  { %v1392_v14 = vmul.f32 1.442695, %v1391_v8  ;;  %v1486_v16 = vsub.f32 0.0, %v1485_v9 }
 0x9ee   :  { %2378 = vpow2.f32 %v1392_v14  ;;  %v1487_v17 = vmul.f32 1.442695, %v1486_v16 }
 0x9ef   :  { %s2315_s6 = spop %2314 }
 0x9f0   :  { %2380 = vpow2.f32 %v1487_v17 }
 0x9fb   :  { %v2379_v18 = vpop.eup %2378 }
 0x9fc   :  { %v1394_v19 = vadd.f32 1.0, %v2379_v18 }
 0x9fd   :  { %v2381_v20 = vpop.eup %2380 }
 0x9fe   :  { %2382 = vrcp.f32 %v1394_v19  ;;  %v1489_v21 = vadd.f32 1.0, %v2381_v20  ;;  %v1744_v19 = vrot.slane %v2699_v58, 6 }
 0xa00   :  { %2384 = vrcp.f32 %v1489_v21 }
 0xa0b   :  { %v2383_v23 = vpop.eup %2382 }
 0xa0c   :  { %v1398_v25 = vsub.f32 %v2383_v23, %v1396_v22 }
 0xa0d   :  { %v2385_v26 = vpop.eup %2384 }
 0xa0e   :  { %v1492_v27 = vrot.slane %v2385_v26, 4  ;;  %v1399_v28 = vmul.f32 %v1398_v25, %v1398_v25 }
 0xa10   :  { %2264 = vmatmul.mubr.msk.f32.vlgmr.msra.gmra.mxu1 %vm248_vm4, %v1492_v27  ;;  %2275 = vmatmul.mubr.msk.f32.vlgmr.msra.gmra.mxu0 %vm248_vm4, %v1492_v27  ;;  %v1400_v29 = vsel %vm360_vm5, %v1399_v28, 0.0 }
 0xa11   :  { %1401 = vadd.xlane.f32.xlu1 %v1400_v29  ;;  %2278 = vmatpush3.msra.mxu1 %v2744_v10 }
 0xa12   :  { %2289 = vmatpush3.msra.mxu0 %v2705_v59  ;;  %2279 = vmatprep.subr.mxu1 %v2428_v1 }
 0xa13   :  { %2290 = vmatprep.subr.mxu0 %v2428_v1  ;;  %2280 = vmatpush3.msra.mxu1 %v2749_v11 }
 0xa14   :  { %2291 = vmatpush3.msra.mxu0 %v2717_v60  ;;  %2281 = vmatprep.subr.mxu1 %v2428_v1 }
 0xa15   :  { %2292 = vmatprep.subr.mxu0 %v2428_v1  ;;  %2282 = vmatpush3.msra.mxu1 %v2757_v12 }
 0xa16   :  { %2293 = vmatpush3.msra.mxu0 %v2724_v61  ;;  %2283 = vmatprep.subr.mxu1 %v2428_v1 }
 0xa17   :  { %2294 = vmatprep.subr.mxu0 %v2428_v1  ;;  %2284 = vmatpush3.msra.mxu1 %v2766_v13 }
 0xa18   :  { %2285 = vmatprep.mubr.msk.f32.mxu1 %vm2429_vm1, %v2428_v1  ;;  %2295 = vmatpush3.msra.mxu0 %v2731_v62 }
 0xa19   :  { %2296 = vmatprep.mubr.msk.f32.mxu0 %vm2429_vm1, %v2428_v1  ;;  %2299 = vmatprep.subr.mxu1 %v2428_v1 }
 0xa9a   :  { %v1402_v59 = vpop.xlane.xlu1 %1401 }
 0xa9b   :  { %v1403_v60 = vrot.slane %v1402_v59, 4 }
 0xa9d   :  { %v1404_v30 = vadd.f32 %v1403_v60, %v1402_v59 }
 0xa9f   :  { %v1405_v61 = vrot.slane %v1404_v30, 2 }
 0xaa1   :  { %v1406_v31 = vadd.f32 %v1405_v61, %v1404_v30 }
 0xaa3   :  { %v1407_v32 = vrot.slane %v1406_v31, 1 }
 0xaa5   :  { %v1408_v33 = vadd.f32 %v1407_v32, %v1406_v31 }
 0xaa7   :  { %2316 = vpush %v1408_v33 }
 0xad0   :  { %v1561_v34 = vpop.f32.mrf.mxu1  ;;  %v1652_v35 = vpop.f32.mrf.mxu0 }
 0xad1   :  { %v1562_v36 = vadd.f32 %v1561_v34, %v2808_v24  ;;  %v1657_v37 = vrot.slane %v1652_v35, 3 }
 0xad2   :  { %v2265_v38 = vpop.f32.mrf.mxu1  ;;  %v2276_v62 = vpop.f32.mrf.mxu0 }
 0xad3   :  { %v1565_v39 = vsub.f32 0.0, %v1562_v36  ;;  %v1659_v40 = vadd.f32 %v1657_v37, %v2780_v15  ;;  %v1918_v37 = vrot.slane %v2699_v58, 7  ;;  %v888_v58 = vstv %s2311_s13 }
 0xad5   :  { %v1566_v41 = vmul.f32 1.442695, %v1565_v39  ;;  %v1660_v42 = vsub.f32 0.0, %v1659_v40 }
 0xad7   :  { %2386 = vpow2.f32 %v1566_v41  ;;  %v1661_v43 = vmul.f32 1.442695, %v1660_v42 }
 0xad8   :  { %s2317_s0 = spop %2316 }
 0xad9   :  { %2388 = vpow2.f32 %v1661_v43 }
 0xae4   :  { %v2387_v44 = vpop.eup %2386 }
 0xae5   :  { %v1568_v45 = vadd.f32 1.0, %v2387_v44 }
 0xae6   :  { %v2389_v46 = vpop.eup %2388 }
 0xae7   :  { %2390 = vrcp.f32 %v1568_v45  ;;  %v1663_v47 = vadd.f32 1.0, %v2389_v46 }
 0xae9   :  { %2392 = vrcp.f32 %v1663_v47  ;;  %v1062_v47 = vstv %s2313_s28 }
 0xaf4   :  { %v2391_v49 = vpop.eup %2390 }
 0xaf5   :  { %v1572_v50 = vsub.f32 %v2391_v49, %v1570_v48  ;;  %v1236_v48 = vstv %s2315_s6  ;;  %v1063_v49 = vadd.f32 %v1062_v47, %v888_v58 }
 0xaf6   :  { %v2393_v51 = vpop.eup %2392 }
 0xaf7   :  { %v1666_v52 = vrot.slane %v2393_v51, 5  ;;  %v1573_v53 = vmul.f32 %v1572_v50, %v1572_v50  ;;  %v1410_v50 = vstv %s2317_s0  ;;  %v1237_v51 = vadd.f32 %v1236_v48, %v1063_v49 }
 0xaf9   :  { %2286 = vmatmul.mubr.msk.f32.vlgmr.msra.gmra.mxu1 %vm248_vm4, %v1666_v52  ;;  %2297 = vmatmul.mubr.msk.f32.vlgmr.msra.gmra.mxu0 %vm248_vm4, %v1666_v52  ;;  %v1574_v54 = vsel %vm360_vm5, %v1573_v53, 0.0  ;;  %v1411_v53 = vadd.f32 %v1410_v50, %v1237_v51 }
 0xafa   :  { %1575 = vadd.xlane.f32.xlu0 %v1574_v54  ;;  %2300 = vmatpush3.msra.mxu1 %v2744_v10 }
 0xafb   :  { %2301 = vmatprep.subr.mxu1 %v2428_v1  ;;  %2307 = vmatprep.mubr.msk.f32.mxu1 %vm2429_vm1, %v2428_v1 }
 0xafc   :  { %2302 = vmatpush3.msra.mxu1 %v2749_v11 }
 0xafd   :  { %2303 = vmatprep.subr.mxu1 %v2428_v1 }
 0xafe   :  { %2304 = vmatpush3.msra.mxu1 %v2757_v12 }
 0xaff   :  { %2305 = vmatprep.subr.mxu1 %v2428_v1 }
 0xb00   :  { %2306 = vmatpush3.msra.mxu1 %v2766_v13 }
 0xb83   :  { %v1576_v55 = vpop.xlane.xlu0 %1575 }
 0xb84   :  { %v1577_v56 = vrot.slane %v1576_v55, 4 }
 0xb86   :  { %v1578_v57 = vadd.f32 %v1577_v56, %v1576_v55 }
 0xb88   :  { %v1579_v63 = vrot.slane %v1578_v57, 2 }
 0xb8a   :  { %v1580_v10 = vadd.f32 %v1579_v63, %v1578_v57 }
 0xb8c   :  { %v1581_v0 = vrot.slane %v1580_v10, 1 }
 0xb8e   :  { %v1582_v2 = vadd.f32 %v1581_v0, %v1580_v10 }
 0xb90   :  { %2318 = vpush %v1582_v2 }
 0xbb9   :  { %v1735_v3 = vpop.f32.mrf.mxu1  ;;  %v1826_v4 = vpop.f32.mrf.mxu0 }
 0xbba   :  { %v1736_v11 = vadd.f32 %v1735_v3, %v2808_v24  ;;  %v1831_v5 = vrot.slane %v1826_v4, 2 }
 0xbbb   :  { %v2287_v6 = vpop.f32.mrf.mxu1  ;;  %v2298_v7 = vpop.f32.mrf.mxu0 }
 0xbbc   :  { %v1739_v12 = vsub.f32 0.0, %v1736_v11  ;;  %v1833_v1 = vadd.f32 %v1831_v5, %v2780_v15 }
 0xbbe   :  { %v1740_v8 = vmul.f32 1.442695, %v1739_v12  ;;  %v1834_v13 = vsub.f32 0.0, %v1833_v1 }
 0xbc0   :  { %2394 = vpow2.f32 %v1740_v8  ;;  %v1835_v9 = vmul.f32 1.442695, %v1834_v13 }
 0xbc1   :  { %s2319_s27 = spop %2318 }
 0xbc2   :  { %2396 = vpow2.f32 %v1835_v9  ;;  %v1584_v52 = vstv %s2319_s27 }
 0xbc3   :  { %v1585_v55 = vadd.f32 %v1584_v52, %v1411_v53 }
 0xbcd   :  { %v2395_v14 = vpop.eup %2394 }
 0xbce   :  { %v1742_v16 = vadd.f32 1.0, %v2395_v14 }
 0xbcf   :  { %v2397_v17 = vpop.eup %2396 }
 0xbd0   :  { %2398 = vrcp.f32 %v1742_v16  ;;  %v1837_v18 = vadd.f32 1.0, %v2397_v17 }
 0xbd2   :  { %2400 = vrcp.f32 %v1837_v18 }
 0xbdd   :  { %v2399_v20 = vpop.eup %2398 }
 0xbde   :  { %v1746_v21 = vsub.f32 %v2399_v20, %v1744_v19 }
 0xbdf   :  { %v2401_v22 = vpop.eup %2400 }
 0xbe0   :  { %v1840_v23 = vrot.slane %v2401_v22, 6  ;;  %v1747_v25 = vmul.f32 %v1746_v21, %v1746_v21 }
 0xbe2   :  { %2308 = vmatmul.mubr.msk.f32.vlgmr.msra.gmra.mxu1 %vm248_vm4, %v1840_v23  ;;  %v1748_v15 = vsel %vm360_vm5, %v1747_v25, 0.0 }
 0xbe3   :  { %1749 = vadd.xlane.f32.xlu1 %v1748_v15 }
 0xc6c   :  { %v1750_v26 = vpop.xlane.xlu1 %1749 }
 0xc6d   :  { %v1751_v27 = vrot.slane %v1750_v26, 4 }
 0xc6f   :  { %v1752_v28 = vadd.f32 %v1751_v27, %v1750_v26 }
 0xc71   :  { %v1753_v29 = vrot.slane %v1752_v28, 2 }
 0xc73   :  { %v1754_v59 = vadd.f32 %v1753_v29, %v1752_v28 }
 0xc75   :  { %v1755_v60 = vrot.slane %v1754_v59, 1 }
 0xc77   :  { %v1756_v30 = vadd.f32 %v1755_v60, %v1754_v59 }
 0xc79   :  { %2320 = vpush %v1756_v30 }
 0xca2   :  { %v1909_v61 = vpop.f32.mrf.mxu1 }
 0xca3   :  { %v1910_v31 = vadd.f32 %v1909_v61, %v2808_v24 }
 0xca4   :  { %v2309_v32 = vpop.f32.mrf.mxu1 }
 0xca5   :  { %v1913_v33 = vsub.f32 0.0, %v1910_v31 }
 0xca7   :  { %v1914_v34 = vmul.f32 1.442695, %v1913_v33 }
 0xca9   :  { %2402 = vpow2.f32 %v1914_v34 }
 0xcaa   :  { %s2321_s19 = spop %2320 }
 0xcab   :  { %v1758_v54 = vstv %s2321_s19 }
 0xcac   :  { %v1759_v56 = vadd.f32 %v1758_v54, %v1585_v55 }
 0xcb6   :  { %v2403_v35 = vpop.eup %2402 }
 0xcb7   :  { %v1916_v36 = vadd.f32 1.0, %v2403_v35 }
 0xcb9   :  { %2404 = vrcp.f32 %v1916_v36 }
 0xcc6   :  { %v2405_v38 = vpop.eup %2404 }
 0xcc7   :  { %v1920_v62 = vsub.f32 %v2405_v38, %v1918_v37 }
 0xcc9   :  { %v1921_v39 = vmul.f32 %v1920_v62, %v1920_v62 }
 0xccb   :  { %v1922_v40 = vsel %vm360_vm5, %v1921_v39, 0.0 }
 0xccc   :  { %1923 = vadd.xlane.f32.xlu0 %v1922_v40 }
 0xd55   :  { %v1924_v41 = vpop.xlane.xlu0 %1923 }
 0xd56   :  { %v1925_v42 = vrot.slane %v1924_v41, 4 }
 0xd58   :  { %v1926_v43 = vadd.f32 %v1925_v42, %v1924_v41 }
 0xd5a   :  { %v1927_v44 = vrot.slane %v1926_v43, 2 }
 0xd5c   :  { %v1928_v24 = vadd.f32 %v1927_v44, %v1926_v43 }
 0xd5e   :  { %v1929_v45 = vrot.slane %v1928_v24, 1 }
 0xd60   :  { %v1930_v46 = vadd.f32 %v1929_v45, %v1928_v24 }
 0xd62   :  { %2322 = vpush %v1930_v46 }
 0xd93   :  { %s2323_s4 = spop %2322 }
 0xd94   :  { %v1932_v57 = vstv %s2323_s4 }
 0xd95   :  { %v1933_v63 = vadd.f32 %v1932_v57, %v1759_v56 }
 0xd97   :  { %v1934_v10 = vmul.f32 0.0078125, %v1933_v63 }
 0xd99   :  { %1936 = vst.msk [vmem:[#allocation3] sm:$0x1] %vm1935_vm13, %v1934_v10 }
 0xd9a   :  { %2417 = shalt.err (!%p2414_p4)
}
 0xd9b   :  { %1946 = dma.vmem_to_hbm [thread:$0]  %s1944_s15, 16, %s2953_s14, [#allocation4]  }
 0xd9c   :  { %2426 = dma.done.wait [#allocation4], 16  }
 0xd9d   :  { %2427 = vsyncadd [#allocation4], 4294967280 }
 0xd9e   :  { %1950 = vsyncpa [#allocation4], 1 }

</bundles_post_ra>
